<compile_context>
chip_gen: v7x
topology: tpu7x:2x2x1
jax: 0.10.0
libtpu: 0.0.40
codegen_flags: <defaults>
</compile_context>

<pallas_src>
import jax
import jax.numpy as jnp
from jax import lax
from jax.experimental import pallas as pl
from jax.experimental.pallas import tpu as pltpu


# ------------------------------ fused kernel --------------------------------

def _lenet_kernel(x_ref, w1_ref, b1_ref, w2_ref, b2_ref,
                  wf1_ref, bf1_ref, wf2_ref, bf2_ref, wf3_ref, bf3_ref,
                  o_ref, p1_ref):
    f32 = jnp.float32

    def pool_select(wo, wi):
        # 0/1 selection matrices: S_even[j, w] = (w == 2j), S_odd[j, w] = (w == 2j+1)
        r = lax.broadcasted_iota(jnp.int32, (wo, wi), 0)
        c = lax.broadcasted_iota(jnp.int32, (wo, wi), 1)
        return (c == 2 * r).astype(f32), (c == 2 * r + 1).astype(f32)

    se13, so13 = pool_select(13, 26)      # pool1: W 26 -> 13
    se5, so5 = pool_select(5, 11)         # pool2: W 11 -> 5 (floor, col 10 dropped)

    w1 = w1_ref[...]                                      # (9, 6): taps x Cout
    b1 = jnp.broadcast_to(b1_ref[...], (26, 6))           # hoisted bias broadcasts
    b2 = jnp.broadcast_to(b2_ref[...], (11, 16))

    # ---- conv1 (1->6, 3x3, valid) + ReLU: one output row (Wout=26, Cout=6) ----
    def conv1_row(ho):
        acc = b1
        for kh in range(3):
            xcol = x_ref[ho + kh]                         # (28, 1): W-major, Cin=1
            for kw in range(3):
                k = kh * 3 + kw
                acc = acc + xcol[kw:kw + 26, :] * w1[k:k + 1, :]   # (26,1)*(1,6)
        return jnp.maximum(acc, 0.0)

    # ---- pool1 (2x2, stride 2), fused with conv1; writes (13,6) rows to scratch ----
    def pool1_step(i, carry):
        t = jnp.maximum(conv1_row(2 * i), conv1_row(2 * i + 1))     # max over H pair
        p1_ref[i] = jnp.maximum(jnp.dot(se13, t, preferred_element_type=f32),
                                jnp.dot(so13, t, preferred_element_type=f32))
        return carry

    lax.fori_loop(0, 13, pool1_step, 0)

    # ---- conv2 (6->16, 3x3, valid) + ReLU: one output row (Wout=11, Cout=16) ----
    def conv2_row(ho):
        acc = b2
        for kh in range(3):
            prow = p1_ref[ho + kh]                        # (13, 6)
            for kw in range(3):
                acc = acc + jnp.dot(prow[kw:kw + 11, :], w2_ref[kh * 3 + kw],
                                    preferred_element_type=f32)     # (11,6)@(6,16)
        return jnp.maximum(acc, 0.0)

    # ---- pool2 (2x2) fused straight into the fc1 contraction ----
    def pool2_step(i, fc_acc):
        t = jnp.maximum(conv2_row(2 * i), conv2_row(2 * i + 1))     # (11, 16)
        pt = jnp.maximum(jnp.dot(se5, t, preferred_element_type=f32),
                         jnp.dot(so5, t, preferred_element_type=f32))  # (5, 16)
        for w in range(5):                                # torch flatten order (c,h,w)
            fc_acc = fc_acc + jnp.dot(pt[w:w + 1, :], wf1_ref[i * 5 + w],
                                      preferred_element_type=f32)   # (1,16)@(16,120)
        return fc_acc

    fc1 = lax.fori_loop(0, 5, pool2_step,
                        jnp.zeros((1, 120), f32) + bf1_ref[...])

    # ---- fc2 / fc3 (all in registers) ----
    h1 = jnp.maximum(fc1, 0.0)
    h2 = jnp.maximum(jnp.dot(h1, wf2_ref[...], preferred_element_type=f32)
                     + bf2_ref[...], 0.0)
    out = jnp.dot(h2, wf3_ref[...], preferred_element_type=f32) + bf3_ref[...]
    o_ref[...] = out                                      # (1, 10) logits, this image


# ------------------------------- wrapper -------------------------------------

def _prepare_params(p):
    """One-time re-layout of torch-style weights for the fused kernel (free)."""
    w1k = jnp.transpose(p["w1"], (2, 3, 1, 0)).reshape(9, 6)        # [kh*3+kw, co]
    w2k = jnp.transpose(p["w2"], (2, 3, 1, 0)).reshape(9, 6, 16)    # [kh*3+kw, ci, co]
    # fc1 rows permuted from torch flatten order (c*25 + h*5 + w) into
    # per-(h, w) contiguous (16, 120) blocks -> no in-kernel flatten needed.
    wf1p = p["wf1"].reshape(16, 5, 5, 120).transpose(1, 2, 0, 3).reshape(25, 16, 120)
    return (w1k, p["b1"].reshape(1, 6), w2k, p["b2"].reshape(1, 16),
            wf1p, p["bf1"].reshape(1, 120), p["wf2"], p["bf2"].reshape(1, 84),
            p["wf3"], p["bf3"].reshape(1, 10))


def lenet_forward(x_nchw, p):
    """x_nchw: (B, 1, 28, 28) float32 -> (B, 10) float32 logits."""
    B = x_nchw.shape[0]
    x4 = x_nchw.reshape(B, 28, 28, 1)       # C == 1: NCHW -> NHWC is a pure reshape
    w1k, b1, w2k, b2, wf1p, bf1, wf2, bf2, wf3, bf3 = _prepare_params(p)

    out = pl.pallas_call(
        _lenet_kernel,
        out_shape=jax.ShapeDtypeStruct((B, 1, 10), jnp.float32),
        grid=(B,),
        in_specs=[
            pl.BlockSpec((None, 28, 28, 1), lambda b: (b, 0, 0, 0)),   # one image/step
            pl.BlockSpec((9, 6),            lambda b: (0, 0)),
            pl.BlockSpec((1, 6),            lambda b: (0, 0)),
            pl.BlockSpec((9, 6, 16),        lambda b: (0, 0, 0)),
            pl.BlockSpec((1, 16),           lambda b: (0, 0)),
            pl.BlockSpec((25, 16, 120),     lambda b: (0, 0, 0)),
            pl.BlockSpec((1, 120),          lambda b: (0, 0)),
            pl.BlockSpec((120, 84),         lambda b: (0, 0)),
            pl.BlockSpec((1, 84),           lambda b: (0, 0)),
            pl.BlockSpec((84, 10),          lambda b: (0, 0)),
            pl.BlockSpec((1, 10),           lambda b: (0, 0)),
        ],
        out_specs=pl.BlockSpec((None, 1, 10), lambda b: (b, 0, 0)),
        scratch_shapes=[pltpu.VMEM((13, 13, 6), jnp.float32)],          # pool1 output
        compiler_params=pltpu.CompilerParams(
            dimension_semantics=("parallel",)),       # batch across TCs (v7x megacore)
    )(x4, w1k, b1, w2k, b2, wf1p, bf1, wf2, bf2, wf3, bf3)
    return out.reshape(B, 10)


# ------------------------------ init & check ---------------------------------

def init_params(key):
    """Deterministic torch-style init: U(-1/sqrt(fan_in), 1/sqrt(fan_in))."""
    def uinit(k, shape, fan_in):
        bound = 1.0 / (fan_in ** 0.5)
        return jax.random.uniform(k, shape, jnp.float32, -bound, bound)

    keys = jax.random.split(key, 10)
    return {
        "w1":  uinit(keys[0], (6, 1, 3, 3), 1 * 9),
        "b1":  uinit(keys[1], (6,),          1 * 9),
        "w2":  uinit(keys[2], (16, 6, 3, 3), 6 * 9),
        "b2":  uinit(keys[3], (16,),         6 * 9),
        "wf1": uinit(keys[4], (400, 120), 400),
        "bf1": uinit(keys[5], (120,),      400),
        "wf2": uinit(keys[6], (120, 84),  120),
        "bf2": uinit(keys[7], (84,),       120),
        "wf3": uinit(keys[8], (84, 10),    84),
        "bf3": uinit(keys[9], (10,),        84),
    }


def lenet_reference(x_nchw, p):
    """Pure-JAX reference mirroring the PyTorch module (sanity check only)."""
    x = jnp.transpose(x_nchw, (0, 2, 3, 1))

    def conv(x, w, b):
        y = lax.conv_general_dilated(x, jnp.transpose(w, (2, 3, 1, 0)), (1, 1),
                                     "VALID",
                                     dimension_numbers=("NHWC", "HWIO", "NHWC"))
        return jax.nn.relu(y + b)

    def pool(x):
        return lax.reduce_window(x, jnp.array(-jnp.inf, x.dtype), lax.max,
                                 (1, 2, 2, 1), (1, 2, 2, 1), "VALID")

    x = pool(conv(x, p["w1"], p["b1"]))
    x = pool(conv(x, p["w2"], p["b2"]))
    B = x.shape[0]
    x = jnp.transpose(x, (0, 3, 1, 2)).reshape(B, -1)   # torch (C,H,W) flatten order
    x = jax.nn.relu(x @ p["wf1"] + p["bf1"])
    x = jax.nn.relu(x @ p["wf2"] + p["bf2"])
    return x @ p["wf3"] + p["bf3"]


if __name__ == "__main__":
    key = jax.random.PRNGKey(0)
    pkey, xkey = jax.random.split(key)
    params = init_params(pkey)
    # LeNet's fc1 (16*5*5) implies 28x28 spatial input; small batch of 2.
    x = jax.random.normal(xkey, (2, 1, 28, 28), jnp.float32)

    out = jax.jit(lenet_forward)(x, params)
    jax.block_until_ready(out)
    assert out.shape == (2, 10) and out.dtype == jnp.float32

    ref = jax.jit(lenet_reference)(x, params)
    err = float(jnp.max(jnp.abs(out - ref)))
    assert err < 1e-2, f"kernel/reference mismatch: max abs err = {err}"
    print("KERNEL_OK")
</pallas_src>

<mosaic_0001>
module attributes {stable_mosaic.version = 11 : i64} {
  func.func @_lenet_kernel(%arg0: i32, %arg1: memref<1x28x28x1xf32, #tpu.memory_space<vmem>>, %arg2: memref<9x6xf32, #tpu.memory_space<vmem>>, %arg3: memref<1x6xf32, #tpu.memory_space<vmem>>, %arg4: memref<9x6x16xf32, #tpu.memory_space<vmem>>, %arg5: memref<1x16xf32, #tpu.memory_space<vmem>>, %arg6: memref<25x16x120xf32, #tpu.memory_space<vmem>>, %arg7: memref<1x120xf32, #tpu.memory_space<vmem>>, %arg8: memref<120x84xf32, #tpu.memory_space<vmem>>, %arg9: memref<1x84xf32, #tpu.memory_space<vmem>>, %arg10: memref<84x10xf32, #tpu.memory_space<vmem>>, %arg11: memref<1x10xf32, #tpu.memory_space<vmem>>, %arg12: memref<1x1x10xf32, #tpu.memory_space<vmem>>, %arg13: memref<13x13x6xf32, #tpu.memory_space<vmem>>) attributes {dimension_semantics = [#tpu.dimension_semantics<parallel>], iteration_bounds = array<i64: 2>, scalar_prefetch = 0 : i64, scratch_operands = 1 : i64, tpu.core_type = #tpu.core_type<tc>, window_params = [{transform_indices = @transform_0, window_bounds = array<i64: 1, 28, 28, 1>}, {pipeline_mode = #tpu.pipeline_mode<synchronous>, transform_indices = @transform_1, window_bounds = array<i64: 9, 6>}, {pipeline_mode = #tpu.pipeline_mode<synchronous>, transform_indices = @transform_2, window_bounds = array<i64: 1, 6>}, {pipeline_mode = #tpu.pipeline_mode<synchronous>, transform_indices = @transform_3, window_bounds = array<i64: 9, 6, 16>}, {pipeline_mode = #tpu.pipeline_mode<synchronous>, transform_indices = @transform_4, window_bounds = array<i64: 1, 16>}, {pipeline_mode = #tpu.pipeline_mode<synchronous>, transform_indices = @transform_5, window_bounds = array<i64: 25, 16, 120>}, {pipeline_mode = #tpu.pipeline_mode<synchronous>, transform_indices = @transform_6, window_bounds = array<i64: 1, 120>}, {pipeline_mode = #tpu.pipeline_mode<synchronous>, transform_indices = @transform_7, window_bounds = array<i64: 120, 84>}, {pipeline_mode = #tpu.pipeline_mode<synchronous>, transform_indices = @transform_8, window_bounds = array<i64: 1, 84>}, {pipeline_mode = #tpu.pipeline_mode<synchronous>, transform_indices = @transform_9, window_bounds = array<i64: 84, 10>}, {pipeline_mode = #tpu.pipeline_mode<synchronous>, transform_indices = @transform_10, window_bounds = array<i64: 1, 10>}, {transform_indices = @transform_11, window_bounds = array<i64: 1, 1, 10>}]} {
    %0 = tpu.iota {dimensions = array<i32: 0>} : vector<13x26xi32>
    %1 = tpu.iota {dimensions = array<i32: 1>} : vector<13x26xi32>
    %c2_i32 = arith.constant 2 : i32
    %2 = vector.broadcast %c2_i32 : i32 to vector<13x26xi32>
    %3 = arith.muli %2, %0 : vector<13x26xi32>
    %4 = arith.cmpi eq, %1, %3 : vector<13x26xi32>
    %5 = arith.extui %4 : vector<13x26xi1> to vector<13x26xi32>
    %6 = arith.sitofp %5 : vector<13x26xi32> to vector<13x26xf32>
    %c2_i32_0 = arith.constant 2 : i32
    %7 = vector.broadcast %c2_i32_0 : i32 to vector<13x26xi32>
    %8 = arith.muli %7, %0 : vector<13x26xi32>
    %c1_i32 = arith.constant 1 : i32
    %9 = vector.broadcast %c1_i32 : i32 to vector<13x26xi32>
    %10 = arith.addi %8, %9 : vector<13x26xi32>
    %11 = arith.cmpi eq, %1, %10 : vector<13x26xi32>
    %12 = arith.extui %11 : vector<13x26xi1> to vector<13x26xi32>
    %13 = arith.sitofp %12 : vector<13x26xi32> to vector<13x26xf32>
    %14 = tpu.iota {dimensions = array<i32: 0>} : vector<5x11xi32>
    %15 = tpu.iota {dimensions = array<i32: 1>} : vector<5x11xi32>
    %c2_i32_1 = arith.constant 2 : i32
    %16 = vector.broadcast %c2_i32_1 : i32 to vector<5x11xi32>
    %17 = arith.muli %16, %14 : vector<5x11xi32>
    %18 = arith.cmpi eq, %15, %17 : vector<5x11xi32>
    %19 = arith.extui %18 : vector<5x11xi1> to vector<5x11xi32>
    %20 = arith.sitofp %19 : vector<5x11xi32> to vector<5x11xf32>
    %c2_i32_2 = arith.constant 2 : i32
    %21 = vector.broadcast %c2_i32_2 : i32 to vector<5x11xi32>
    %22 = arith.muli %21, %14 : vector<5x11xi32>
    %c1_i32_3 = arith.constant 1 : i32
    %23 = vector.broadcast %c1_i32_3 : i32 to vector<5x11xi32>
    %24 = arith.addi %22, %23 : vector<5x11xi32>
    %25 = arith.cmpi eq, %15, %24 : vector<5x11xi32>
    %26 = arith.extui %25 : vector<5x11xi1> to vector<5x11xi32>
    %27 = arith.sitofp %26 : vector<5x11xi32> to vector<5x11xf32>
    %c0 = arith.constant 0 : index
    %c0_4 = arith.constant 0 : index
    %28 = vector.load %arg2[%c0, %c0_4] : memref<9x6xf32, #tpu.memory_space<vmem>>, vector<9x6xf32>
    %c0_5 = arith.constant 0 : index
    %c0_6 = arith.constant 0 : index
    %29 = vector.load %arg3[%c0_5, %c0_6] : memref<1x6xf32, #tpu.memory_space<vmem>>, vector<1x6xf32>
    %30 = vector.shape_cast %29 : vector<1x6xf32> to vector<1x6xf32>
    %31 = vector.broadcast %30 : vector<1x6xf32> to vector<26x6xf32>
    %c0_7 = arith.constant 0 : index
    %c0_8 = arith.constant 0 : index
    %32 = vector.load %arg5[%c0_7, %c0_8] : memref<1x16xf32, #tpu.memory_space<vmem>>, vector<1x16xf32>
    %33 = vector.shape_cast %32 : vector<1x16xf32> to vector<1x16xf32>
    %34 = vector.broadcast %33 : vector<1x16xf32> to vector<11x16xf32>
    %c0_i32 = arith.constant 0 : i32
    %c13_i32 = arith.constant 13 : i32
    %35 = arith.addi %c0_i32, %c13_i32 : i32
    %c1_i32_9 = arith.constant 1 : i32
    scf.for %arg14 = %c0_i32 to %35 step %c1_i32_9  : i32 {
      %c2_i32_31 = arith.constant 2 : i32
      %56 = arith.muli %c2_i32_31, %arg14 : i32
      %c0_i32_32 = arith.constant 0 : i32
      %57 = arith.addi %56, %c0_i32_32 : i32
      %c0_33 = arith.constant 0 : index
      %58 = arith.index_cast %57 : i32 to index
      %c0_34 = arith.constant 0 : index
      %c0_35 = arith.constant 0 : index
      %59 = vector.load %arg1[%c0_33, %58, %c0_34, %c0_35] : memref<1x28x28x1xf32, #tpu.memory_space<vmem>>, vector<1x1x28x1xf32>
      %60 = vector.shape_cast %59 : vector<1x1x28x1xf32> to vector<28x1xf32>
      %61 = vector.extract_strided_slice %60 {offsets = [0, 0], sizes = [26, 1], strides = [1, 1]} : vector<28x1xf32> to vector<26x1xf32>
      %62 = vector.extract_strided_slice %28 {offsets = [0, 0], sizes = [1, 6], strides = [1, 1]} : vector<9x6xf32> to vector<1x6xf32>
      %63 = vector.broadcast %61 : vector<26x1xf32> to vector<26x6xf32>
      %64 = vector.broadcast %62 : vector<1x6xf32> to vector<26x6xf32>
      %65 = arith.mulf %63, %64 : vector<26x6xf32>
      %66 = arith.addf %31, %65 : vector<26x6xf32>
      %67 = vector.extract_strided_slice %60 {offsets = [1, 0], sizes = [26, 1], strides = [1, 1]} : vector<28x1xf32> to vector<26x1xf32>
      %68 = vector.extract_strided_slice %28 {offsets = [1, 0], sizes = [1, 6], strides = [1, 1]} : vector<9x6xf32> to vector<1x6xf32>
      %69 = vector.broadcast %67 : vector<26x1xf32> to vector<26x6xf32>
      %70 = vector.broadcast %68 : vector<1x6xf32> to vector<26x6xf32>
      %71 = arith.mulf %69, %70 : vector<26x6xf32>
      %72 = arith.addf %66, %71 : vector<26x6xf32>
      %73 = vector.extract_strided_slice %60 {offsets = [2, 0], sizes = [26, 1], strides = [1, 1]} : vector<28x1xf32> to vector<26x1xf32>
      %74 = vector.extract_strided_slice %28 {offsets = [2, 0], sizes = [1, 6], strides = [1, 1]} : vector<9x6xf32> to vector<1x6xf32>
      %75 = vector.broadcast %73 : vector<26x1xf32> to vector<26x6xf32>
      %76 = vector.broadcast %74 : vector<1x6xf32> to vector<26x6xf32>
      %77 = arith.mulf %75, %76 : vector<26x6xf32>
      %78 = arith.addf %72, %77 : vector<26x6xf32>
      %c1_i32_36 = arith.constant 1 : i32
      %79 = arith.addi %56, %c1_i32_36 : i32
      %c0_37 = arith.constant 0 : index
      %80 = arith.index_cast %79 : i32 to index
      %c0_38 = arith.constant 0 : index
      %c0_39 = arith.constant 0 : index
      %81 = vector.load %arg1[%c0_37, %80, %c0_38, %c0_39] : memref<1x28x28x1xf32, #tpu.memory_space<vmem>>, vector<1x1x28x1xf32>
      %82 = vector.shape_cast %81 : vector<1x1x28x1xf32> to vector<28x1xf32>
      %83 = vector.extract_strided_slice %82 {offsets = [0, 0], sizes = [26, 1], strides = [1, 1]} : vector<28x1xf32> to vector<26x1xf32>
      %84 = vector.extract_strided_slice %28 {offsets = [3, 0], sizes = [1, 6], strides = [1, 1]} : vector<9x6xf32> to vector<1x6xf32>
      %85 = vector.broadcast %83 : vector<26x1xf32> to vector<26x6xf32>
      %86 = vector.broadcast %84 : vector<1x6xf32> to vector<26x6xf32>
      %87 = arith.mulf %85, %86 : vector<26x6xf32>
      %88 = arith.addf %78, %87 : vector<26x6xf32>
      %89 = vector.extract_strided_slice %82 {offsets = [1, 0], sizes = [26, 1], strides = [1, 1]} : vector<28x1xf32> to vector<26x1xf32>
      %90 = vector.extract_strided_slice %28 {offsets = [4, 0], sizes = [1, 6], strides = [1, 1]} : vector<9x6xf32> to vector<1x6xf32>
      %91 = vector.broadcast %89 : vector<26x1xf32> to vector<26x6xf32>
      %92 = vector.broadcast %90 : vector<1x6xf32> to vector<26x6xf32>
      %93 = arith.mulf %91, %92 : vector<26x6xf32>
      %94 = arith.addf %88, %93 : vector<26x6xf32>
      %95 = vector.extract_strided_slice %82 {offsets = [2, 0], sizes = [26, 1], strides = [1, 1]} : vector<28x1xf32> to vector<26x1xf32>
      %96 = vector.extract_strided_slice %28 {offsets = [5, 0], sizes = [1, 6], strides = [1, 1]} : vector<9x6xf32> to vector<1x6xf32>
      %97 = vector.broadcast %95 : vector<26x1xf32> to vector<26x6xf32>
      %98 = vector.broadcast %96 : vector<1x6xf32> to vector<26x6xf32>
      %99 = arith.mulf %97, %98 : vector<26x6xf32>
      %100 = arith.addf %94, %99 : vector<26x6xf32>
      %c2_i32_40 = arith.constant 2 : i32
      %101 = arith.addi %56, %c2_i32_40 : i32
      %c0_41 = arith.constant 0 : index
      %102 = arith.index_cast %101 : i32 to index
      %c0_42 = arith.constant 0 : index
      %c0_43 = arith.constant 0 : index
      %103 = vector.load %arg1[%c0_41, %102, %c0_42, %c0_43] : memref<1x28x28x1xf32, #tpu.memory_space<vmem>>, vector<1x1x28x1xf32>
      %104 = vector.shape_cast %103 : vector<1x1x28x1xf32> to vector<28x1xf32>
      %105 = vector.extract_strided_slice %104 {offsets = [0, 0], sizes = [26, 1], strides = [1, 1]} : vector<28x1xf32> to vector<26x1xf32>
      %106 = vector.extract_strided_slice %28 {offsets = [6, 0], sizes = [1, 6], strides = [1, 1]} : vector<9x6xf32> to vector<1x6xf32>
      %107 = vector.broadcast %105 : vector<26x1xf32> to vector<26x6xf32>
      %108 = vector.broadcast %106 : vector<1x6xf32> to vector<26x6xf32>
      %109 = arith.mulf %107, %108 : vector<26x6xf32>
      %110 = arith.addf %100, %109 : vector<26x6xf32>
      %111 = vector.extract_strided_slice %104 {offsets = [1, 0], sizes = [26, 1], strides = [1, 1]} : vector<28x1xf32> to vector<26x1xf32>
      %112 = vector.extract_strided_slice %28 {offsets = [7, 0], sizes = [1, 6], strides = [1, 1]} : vector<9x6xf32> to vector<1x6xf32>
      %113 = vector.broadcast %111 : vector<26x1xf32> to vector<26x6xf32>
      %114 = vector.broadcast %112 : vector<1x6xf32> to vector<26x6xf32>
      %115 = arith.mulf %113, %114 : vector<26x6xf32>
      %116 = arith.addf %110, %115 : vector<26x6xf32>
      %117 = vector.extract_strided_slice %104 {offsets = [2, 0], sizes = [26, 1], strides = [1, 1]} : vector<28x1xf32> to vector<26x1xf32>
      %118 = vector.extract_strided_slice %28 {offsets = [8, 0], sizes = [1, 6], strides = [1, 1]} : vector<9x6xf32> to vector<1x6xf32>
      %119 = vector.broadcast %117 : vector<26x1xf32> to vector<26x6xf32>
      %120 = vector.broadcast %118 : vector<1x6xf32> to vector<26x6xf32>
      %121 = arith.mulf %119, %120 : vector<26x6xf32>
      %122 = arith.addf %116, %121 : vector<26x6xf32>
      %cst_44 = arith.constant 0.000000e+00 : f32
      %123 = vector.broadcast %cst_44 : f32 to vector<26x6xf32>
      %124 = arith.maximumf %122, %123 : vector<26x6xf32>
      %c2_i32_45 = arith.constant 2 : i32
      %125 = arith.muli %c2_i32_45, %arg14 : i32
      %c1_i32_46 = arith.constant 1 : i32
      %126 = arith.addi %125, %c1_i32_46 : i32
      %c0_i32_47 = arith.constant 0 : i32
      %127 = arith.addi %126, %c0_i32_47 : i32
      %c0_48 = arith.constant 0 : index
      %128 = arith.index_cast %127 : i32 to index
      %c0_49 = arith.constant 0 : index
      %c0_50 = arith.constant 0 : index
      %129 = vector.load %arg1[%c0_48, %128, %c0_49, %c0_50] : memref<1x28x28x1xf32, #tpu.memory_space<vmem>>, vector<1x1x28x1xf32>
      %130 = vector.shape_cast %129 : vector<1x1x28x1xf32> to vector<28x1xf32>
      %131 = vector.extract_strided_slice %130 {offsets = [0, 0], sizes = [26, 1], strides = [1, 1]} : vector<28x1xf32> to vector<26x1xf32>
      %132 = vector.extract_strided_slice %28 {offsets = [0, 0], sizes = [1, 6], strides = [1, 1]} : vector<9x6xf32> to vector<1x6xf32>
      %133 = vector.broadcast %131 : vector<26x1xf32> to vector<26x6xf32>
      %134 = vector.broadcast %132 : vector<1x6xf32> to vector<26x6xf32>
      %135 = arith.mulf %133, %134 : vector<26x6xf32>
      %136 = arith.addf %31, %135 : vector<26x6xf32>
      %137 = vector.extract_strided_slice %130 {offsets = [1, 0], sizes = [26, 1], strides = [1, 1]} : vector<28x1xf32> to vector<26x1xf32>
      %138 = vector.extract_strided_slice %28 {offsets = [1, 0], sizes = [1, 6], strides = [1, 1]} : vector<9x6xf32> to vector<1x6xf32>
      %139 = vector.broadcast %137 : vector<26x1xf32> to vector<26x6xf32>
      %140 = vector.broadcast %138 : vector<1x6xf32> to vector<26x6xf32>
      %141 = arith.mulf %139, %140 : vector<26x6xf32>
      %142 = arith.addf %136, %141 : vector<26x6xf32>
      %143 = vector.extract_strided_slice %130 {offsets = [2, 0], sizes = [26, 1], strides = [1, 1]} : vector<28x1xf32> to vector<26x1xf32>
      %144 = vector.extract_strided_slice %28 {offsets = [2, 0], sizes = [1, 6], strides = [1, 1]} : vector<9x6xf32> to vector<1x6xf32>
      %145 = vector.broadcast %143 : vector<26x1xf32> to vector<26x6xf32>
      %146 = vector.broadcast %144 : vector<1x6xf32> to vector<26x6xf32>
      %147 = arith.mulf %145, %146 : vector<26x6xf32>
      %148 = arith.addf %142, %147 : vector<26x6xf32>
      %c1_i32_51 = arith.constant 1 : i32
      %149 = arith.addi %126, %c1_i32_51 : i32
      %c0_52 = arith.constant 0 : index
      %150 = arith.index_cast %149 : i32 to index
      %c0_53 = arith.constant 0 : index
      %c0_54 = arith.constant 0 : index
      %151 = vector.load %arg1[%c0_52, %150, %c0_53, %c0_54] : memref<1x28x28x1xf32, #tpu.memory_space<vmem>>, vector<1x1x28x1xf32>
      %152 = vector.shape_cast %151 : vector<1x1x28x1xf32> to vector<28x1xf32>
      %153 = vector.extract_strided_slice %152 {offsets = [0, 0], sizes = [26, 1], strides = [1, 1]} : vector<28x1xf32> to vector<26x1xf32>
      %154 = vector.extract_strided_slice %28 {offsets = [3, 0], sizes = [1, 6], strides = [1, 1]} : vector<9x6xf32> to vector<1x6xf32>
      %155 = vector.broadcast %153 : vector<26x1xf32> to vector<26x6xf32>
      %156 = vector.broadcast %154 : vector<1x6xf32> to vector<26x6xf32>
      %157 = arith.mulf %155, %156 : vector<26x6xf32>
      %158 = arith.addf %148, %157 : vector<26x6xf32>
      %159 = vector.extract_strided_slice %152 {offsets = [1, 0], sizes = [26, 1], strides = [1, 1]} : vector<28x1xf32> to vector<26x1xf32>
      %160 = vector.extract_strided_slice %28 {offsets = [4, 0], sizes = [1, 6], strides = [1, 1]} : vector<9x6xf32> to vector<1x6xf32>
      %161 = vector.broadcast %159 : vector<26x1xf32> to vector<26x6xf32>
      %162 = vector.broadcast %160 : vector<1x6xf32> to vector<26x6xf32>
      %163 = arith.mulf %161, %162 : vector<26x6xf32>
      %164 = arith.addf %158, %163 : vector<26x6xf32>
      %165 = vector.extract_strided_slice %152 {offsets = [2, 0], sizes = [26, 1], strides = [1, 1]} : vector<28x1xf32> to vector<26x1xf32>
      %166 = vector.extract_strided_slice %28 {offsets = [5, 0], sizes = [1, 6], strides = [1, 1]} : vector<9x6xf32> to vector<1x6xf32>
      %167 = vector.broadcast %165 : vector<26x1xf32> to vector<26x6xf32>
      %168 = vector.broadcast %166 : vector<1x6xf32> to vector<26x6xf32>
      %169 = arith.mulf %167, %168 : vector<26x6xf32>
      %170 = arith.addf %164, %169 : vector<26x6xf32>
      %c2_i32_55 = arith.constant 2 : i32
      %171 = arith.addi %126, %c2_i32_55 : i32
      %c0_56 = arith.constant 0 : index
      %172 = arith.index_cast %171 : i32 to index
      %c0_57 = arith.constant 0 : index
      %c0_58 = arith.constant 0 : index
      %173 = vector.load %arg1[%c0_56, %172, %c0_57, %c0_58] : memref<1x28x28x1xf32, #tpu.memory_space<vmem>>, vector<1x1x28x1xf32>
      %174 = vector.shape_cast %173 : vector<1x1x28x1xf32> to vector<28x1xf32>
      %175 = vector.extract_strided_slice %174 {offsets = [0, 0], sizes = [26, 1], strides = [1, 1]} : vector<28x1xf32> to vector<26x1xf32>
      %176 = vector.extract_strided_slice %28 {offsets = [6, 0], sizes = [1, 6], strides = [1, 1]} : vector<9x6xf32> to vector<1x6xf32>
      %177 = vector.broadcast %175 : vector<26x1xf32> to vector<26x6xf32>
      %178 = vector.broadcast %176 : vector<1x6xf32> to vector<26x6xf32>
      %179 = arith.mulf %177, %178 : vector<26x6xf32>
      %180 = arith.addf %170, %179 : vector<26x6xf32>
      %181 = vector.extract_strided_slice %174 {offsets = [1, 0], sizes = [26, 1], strides = [1, 1]} : vector<28x1xf32> to vector<26x1xf32>
      %182 = vector.extract_strided_slice %28 {offsets = [7, 0], sizes = [1, 6], strides = [1, 1]} : vector<9x6xf32> to vector<1x6xf32>
      %183 = vector.broadcast %181 : vector<26x1xf32> to vector<26x6xf32>
      %184 = vector.broadcast %182 : vector<1x6xf32> to vector<26x6xf32>
      %185 = arith.mulf %183, %184 : vector<26x6xf32>
      %186 = arith.addf %180, %185 : vector<26x6xf32>
      %187 = vector.extract_strided_slice %174 {offsets = [2, 0], sizes = [26, 1], strides = [1, 1]} : vector<28x1xf32> to vector<26x1xf32>
      %188 = vector.extract_strided_slice %28 {offsets = [8, 0], sizes = [1, 6], strides = [1, 1]} : vector<9x6xf32> to vector<1x6xf32>
      %189 = vector.broadcast %187 : vector<26x1xf32> to vector<26x6xf32>
      %190 = vector.broadcast %188 : vector<1x6xf32> to vector<26x6xf32>
      %191 = arith.mulf %189, %190 : vector<26x6xf32>
      %192 = arith.addf %186, %191 : vector<26x6xf32>
      %cst_59 = arith.constant 0.000000e+00 : f32
      %193 = vector.broadcast %cst_59 : f32 to vector<26x6xf32>
      %194 = arith.maximumf %192, %193 : vector<26x6xf32>
      %195 = arith.maximumf %124, %194 : vector<26x6xf32>
      %cst_60 = arith.constant dense<0.000000e+00> : vector<13x6xf32>
      %196 = tpu.matmul %6, %195, %cst_60 {dimension_numbers = #tpu.dot_dimension_numbers<[1], [0], [0], [1], [0, 0, 1, 1], [], []>} : vector<13x26xf32>, vector<26x6xf32>, vector<13x6xf32> -> vector<13x6xf32>
      %cst_61 = arith.constant dense<0.000000e+00> : vector<13x6xf32>
      %197 = tpu.matmul %13, %195, %cst_61 {dimension_numbers = #tpu.dot_dimension_numbers<[1], [0], [0], [1], [0, 0, 1, 1], [], []>} : vector<13x26xf32>, vector<26x6xf32>, vector<13x6xf32> -> vector<13x6xf32>
      %198 = arith.maximumf %196, %197 : vector<13x6xf32>
      %199 = arith.index_cast %arg14 : i32 to index
      %c0_62 = arith.constant 0 : index
      %c0_63 = arith.constant 0 : index
      %200 = vector.load %arg13[%199, %c0_62, %c0_63] : memref<13x13x6xf32, #tpu.memory_space<vmem>>, vector<1x13x6xf32>
      %201 = vector.shape_cast %200 : vector<1x13x6xf32> to vector<13x6xf32>
      %202 = vector.shape_cast %198 : vector<13x6xf32> to vector<1x13x6xf32>
      tpu.vector_store %arg13[%199, %c0_62, %c0_63], %202 {strides = array<i32>} : memref<13x13x6xf32, #tpu.memory_space<vmem>>, vector<1x13x6xf32>,
    }
    %c13_i32_10 = arith.constant 13 : i32
    %cst = arith.constant 0.000000e+00 : f32
    %36 = vector.broadcast %cst : f32 to vector<1x120xf32>
    %c0_11 = arith.constant 0 : index
    %c0_12 = arith.constant 0 : index
    %37 = vector.load %arg7[%c0_11, %c0_12] : memref<1x120xf32, #tpu.memory_space<vmem>>, vector<1x120xf32>
    %38 = arith.addf %36, %37 : vector<1x120xf32>
    %c0_i32_13 = arith.constant 0 : i32
    %c5_i32 = arith.constant 5 : i32
    %39 = arith.addi %c0_i32_13, %c5_i32 : i32
    %c1_i32_14 = arith.constant 1 : i32
    %40 = scf.for %arg14 = %c0_i32_13 to %39 step %c1_i32_14 iter_args(%arg15 = %38) -> (vector<1x120xf32>)  : i32 {
      %c2_i32_31 = arith.constant 2 : i32
      %56 = arith.muli %c2_i32_31, %arg14 : i32
      %c0_i32_32 = arith.constant 0 : i32
      %57 = arith.addi %56, %c0_i32_32 : i32
      %58 = arith.index_cast %57 : i32 to index
      %c0_33 = arith.constant 0 : index
      %c0_34 = arith.constant 0 : index
      %59 = vector.load %arg13[%58, %c0_33, %c0_34] : memref<13x13x6xf32, #tpu.memory_space<vmem>>, vector<1x13x6xf32>
      %60 = vector.shape_cast %59 : vector<1x13x6xf32> to vector<13x6xf32>
      %61 = vector.extract_strided_slice %60 {offsets = [0, 0], sizes = [11, 6], strides = [1, 1]} : vector<13x6xf32> to vector<11x6xf32>
      %c0_35 = arith.constant 0 : index
      %c0_36 = arith.constant 0 : index
      %c0_37 = arith.constant 0 : index
      %62 = vector.load %arg4[%c0_35, %c0_36, %c0_37] : memref<9x6x16xf32, #tpu.memory_space<vmem>>, vector<1x6x16xf32>
      %63 = vector.shape_cast %62 : vector<1x6x16xf32> to vector<6x16xf32>
      %cst_38 = arith.constant dense<0.000000e+00> : vector<11x16xf32>
      %64 = tpu.matmul %61, %63, %cst_38 {dimension_numbers = #tpu.dot_dimension_numbers<[1], [0], [0], [1], [0, 0, 1, 1], [], []>} : vector<11x6xf32>, vector<6x16xf32>, vector<11x16xf32> -> vector<11x16xf32>
      %65 = arith.addf %34, %64 : vector<11x16xf32>
      %66 = vector.extract_strided_slice %60 {offsets = [1, 0], sizes = [11, 6], strides = [1, 1]} : vector<13x6xf32> to vector<11x6xf32>
      %c1 = arith.constant 1 : index
      %c0_39 = arith.constant 0 : index
      %c0_40 = arith.constant 0 : index
      %67 = vector.load %arg4[%c1, %c0_39, %c0_40] : memref<9x6x16xf32, #tpu.memory_space<vmem>>, vector<1x6x16xf32>
      %68 = vector.shape_cast %67 : vector<1x6x16xf32> to vector<6x16xf32>
      %cst_41 = arith.constant dense<0.000000e+00> : vector<11x16xf32>
      %69 = tpu.matmul %66, %68, %cst_41 {dimension_numbers = #tpu.dot_dimension_numbers<[1], [0], [0], [1], [0, 0, 1, 1], [], []>} : vector<11x6xf32>, vector<6x16xf32>, vector<11x16xf32> -> vector<11x16xf32>
      %70 = arith.addf %65, %69 : vector<11x16xf32>
      %71 = vector.extract_strided_slice %60 {offsets = [2, 0], sizes = [11, 6], strides = [1, 1]} : vector<13x6xf32> to vector<11x6xf32>
      %c2 = arith.constant 2 : index
      %c0_42 = arith.constant 0 : index
      %c0_43 = arith.constant 0 : index
      %72 = vector.load %arg4[%c2, %c0_42, %c0_43] : memref<9x6x16xf32, #tpu.memory_space<vmem>>, vector<1x6x16xf32>
      %73 = vector.shape_cast %72 : vector<1x6x16xf32> to vector<6x16xf32>
      %cst_44 = arith.constant dense<0.000000e+00> : vector<11x16xf32>
      %74 = tpu.matmul %71, %73, %cst_44 {dimension_numbers = #tpu.dot_dimension_numbers<[1], [0], [0], [1], [0, 0, 1, 1], [], []>} : vector<11x6xf32>, vector<6x16xf32>, vector<11x16xf32> -> vector<11x16xf32>
      %75 = arith.addf %70, %74 : vector<11x16xf32>
      %c1_i32_45 = arith.constant 1 : i32
      %76 = arith.addi %56, %c1_i32_45 : i32
      %77 = arith.index_cast %76 : i32 to index
      %c0_46 = arith.constant 0 : index
      %c0_47 = arith.constant 0 : index
      %78 = vector.load %arg13[%77, %c0_46, %c0_47] : memref<13x13x6xf32, #tpu.memory_space<vmem>>, vector<1x13x6xf32>
      %79 = vector.shape_cast %78 : vector<1x13x6xf32> to vector<13x6xf32>
      %80 = vector.extract_strided_slice %79 {offsets = [0, 0], sizes = [11, 6], strides = [1, 1]} : vector<13x6xf32> to vector<11x6xf32>
      %c3 = arith.constant 3 : index
      %c0_48 = arith.constant 0 : index
      %c0_49 = arith.constant 0 : index
      %81 = vector.load %arg4[%c3, %c0_48, %c0_49] : memref<9x6x16xf32, #tpu.memory_space<vmem>>, vector<1x6x16xf32>
      %82 = vector.shape_cast %81 : vector<1x6x16xf32> to vector<6x16xf32>
      %cst_50 = arith.constant dense<0.000000e+00> : vector<11x16xf32>
      %83 = tpu.matmul %80, %82, %cst_50 {dimension_numbers = #tpu.dot_dimension_numbers<[1], [0], [0], [1], [0, 0, 1, 1], [], []>} : vector<11x6xf32>, vector<6x16xf32>, vector<11x16xf32> -> vector<11x16xf32>
      %84 = arith.addf %75, %83 : vector<11x16xf32>
      %85 = vector.extract_strided_slice %79 {offsets = [1, 0], sizes = [11, 6], strides = [1, 1]} : vector<13x6xf32> to vector<11x6xf32>
      %c4 = arith.constant 4 : index
      %c0_51 = arith.constant 0 : index
      %c0_52 = arith.constant 0 : index
      %86 = vector.load %arg4[%c4, %c0_51, %c0_52] : memref<9x6x16xf32, #tpu.memory_space<vmem>>, vector<1x6x16xf32>
      %87 = vector.shape_cast %86 : vector<1x6x16xf32> to vector<6x16xf32>
      %cst_53 = arith.constant dense<0.000000e+00> : vector<11x16xf32>
      %88 = tpu.matmul %85, %87, %cst_53 {dimension_numbers = #tpu.dot_dimension_numbers<[1], [0], [0], [1], [0, 0, 1, 1], [], []>} : vector<11x6xf32>, vector<6x16xf32>, vector<11x16xf32> -> vector<11x16xf32>
      %89 = arith.addf %84, %88 : vector<11x16xf32>
      %90 = vector.extract_strided_slice %79 {offsets = [2, 0], sizes = [11, 6], strides = [1, 1]} : vector<13x6xf32> to vector<11x6xf32>
      %c5 = arith.constant 5 : index
      %c0_54 = arith.constant 0 : index
      %c0_55 = arith.constant 0 : index
      %91 = vector.load %arg4[%c5, %c0_54, %c0_55] : memref<9x6x16xf32, #tpu.memory_space<vmem>>, vector<1x6x16xf32>
      %92 = vector.shape_cast %91 : vector<1x6x16xf32> to vector<6x16xf32>
      %cst_56 = arith.constant dense<0.000000e+00> : vector<11x16xf32>
      %93 = tpu.matmul %90, %92, %cst_56 {dimension_numbers = #tpu.dot_dimension_numbers<[1], [0], [0], [1], [0, 0, 1, 1], [], []>} : vector<11x6xf32>, vector<6x16xf32>, vector<11x16xf32> -> vector<11x16xf32>
      %94 = arith.addf %89, %93 : vector<11x16xf32>
      %c2_i32_57 = arith.constant 2 : i32
      %95 = arith.addi %56, %c2_i32_57 : i32
      %96 = arith.index_cast %95 : i32 to index
      %c0_58 = arith.constant 0 : index
      %c0_59 = arith.constant 0 : index
      %97 = vector.load %arg13[%96, %c0_58, %c0_59] : memref<13x13x6xf32, #tpu.memory_space<vmem>>, vector<1x13x6xf32>
      %98 = vector.shape_cast %97 : vector<1x13x6xf32> to vector<13x6xf32>
      %99 = vector.extract_strided_slice %98 {offsets = [0, 0], sizes = [11, 6], strides = [1, 1]} : vector<13x6xf32> to vector<11x6xf32>
      %c6 = arith.constant 6 : index
      %c0_60 = arith.constant 0 : index
      %c0_61 = arith.constant 0 : index
      %100 = vector.load %arg4[%c6, %c0_60, %c0_61] : memref<9x6x16xf32, #tpu.memory_space<vmem>>, vector<1x6x16xf32>
      %101 = vector.shape_cast %100 : vector<1x6x16xf32> to vector<6x16xf32>
      %cst_62 = arith.constant dense<0.000000e+00> : vector<11x16xf32>
      %102 = tpu.matmul %99, %101, %cst_62 {dimension_numbers = #tpu.dot_dimension_numbers<[1], [0], [0], [1], [0, 0, 1, 1], [], []>} : vector<11x6xf32>, vector<6x16xf32>, vector<11x16xf32> -> vector<11x16xf32>
      %103 = arith.addf %94, %102 : vector<11x16xf32>
      %104 = vector.extract_strided_slice %98 {offsets = [1, 0], sizes = [11, 6], strides = [1, 1]} : vector<13x6xf32> to vector<11x6xf32>
      %c7 = arith.constant 7 : index
      %c0_63 = arith.constant 0 : index
      %c0_64 = arith.constant 0 : index
      %105 = vector.load %arg4[%c7, %c0_63, %c0_64] : memref<9x6x16xf32, #tpu.memory_space<vmem>>, vector<1x6x16xf32>
      %106 = vector.shape_cast %105 : vector<1x6x16xf32> to vector<6x16xf32>
      %cst_65 = arith.constant dense<0.000000e+00> : vector<11x16xf32>
      %107 = tpu.matmul %104, %106, %cst_65 {dimension_numbers = #tpu.dot_dimension_numbers<[1], [0], [0], [1], [0, 0, 1, 1], [], []>} : vector<11x6xf32>, vector<6x16xf32>, vector<11x16xf32> -> vector<11x16xf32>
      %108 = arith.addf %103, %107 : vector<11x16xf32>
      %109 = vector.extract_strided_slice %98 {offsets = [2, 0], sizes = [11, 6], strides = [1, 1]} : vector<13x6xf32> to vector<11x6xf32>
      %c8 = arith.constant 8 : index
      %c0_66 = arith.constant 0 : index
      %c0_67 = arith.constant 0 : index
      %110 = vector.load %arg4[%c8, %c0_66, %c0_67] : memref<9x6x16xf32, #tpu.memory_space<vmem>>, vector<1x6x16xf32>
      %111 = vector.shape_cast %110 : vector<1x6x16xf32> to vector<6x16xf32>
      %cst_68 = arith.constant dense<0.000000e+00> : vector<11x16xf32>
      %112 = tpu.matmul %109, %111, %cst_68 {dimension_numbers = #tpu.dot_dimension_numbers<[1], [0], [0], [1], [0, 0, 1, 1], [], []>} : vector<11x6xf32>, vector<6x16xf32>, vector<11x16xf32> -> vector<11x16xf32>
      %113 = arith.addf %108, %112 : vector<11x16xf32>
      %cst_69 = arith.constant 0.000000e+00 : f32
      %114 = vector.broadcast %cst_69 : f32 to vector<11x16xf32>
      %115 = arith.maximumf %113, %114 : vector<11x16xf32>
      %c2_i32_70 = arith.constant 2 : i32
      %116 = arith.muli %c2_i32_70, %arg14 : i32
      %c1_i32_71 = arith.constant 1 : i32
      %117 = arith.addi %116, %c1_i32_71 : i32
      %c0_i32_72 = arith.constant 0 : i32
      %118 = arith.addi %117, %c0_i32_72 : i32
      %119 = arith.index_cast %118 : i32 to index
      %c0_73 = arith.constant 0 : index
      %c0_74 = arith.constant 0 : index
      %120 = vector.load %arg13[%119, %c0_73, %c0_74] : memref<13x13x6xf32, #tpu.memory_space<vmem>>, vector<1x13x6xf32>
      %121 = vector.shape_cast %120 : vector<1x13x6xf32> to vector<13x6xf32>
      %122 = vector.extract_strided_slice %121 {offsets = [0, 0], sizes = [11, 6], strides = [1, 1]} : vector<13x6xf32> to vector<11x6xf32>
      %c0_75 = arith.constant 0 : index
      %c0_76 = arith.constant 0 : index
      %c0_77 = arith.constant 0 : index
      %123 = vector.load %arg4[%c0_75, %c0_76, %c0_77] : memref<9x6x16xf32, #tpu.memory_space<vmem>>, vector<1x6x16xf32>
      %124 = vector.shape_cast %123 : vector<1x6x16xf32> to vector<6x16xf32>
      %cst_78 = arith.constant dense<0.000000e+00> : vector<11x16xf32>
      %125 = tpu.matmul %122, %124, %cst_78 {dimension_numbers = #tpu.dot_dimension_numbers<[1], [0], [0], [1], [0, 0, 1, 1], [], []>} : vector<11x6xf32>, vector<6x16xf32>, vector<11x16xf32> -> vector<11x16xf32>
      %126 = arith.addf %34, %125 : vector<11x16xf32>
      %127 = vector.extract_strided_slice %121 {offsets = [1, 0], sizes = [11, 6], strides = [1, 1]} : vector<13x6xf32> to vector<11x6xf32>
      %c1_79 = arith.constant 1 : index
      %c0_80 = arith.constant 0 : index
      %c0_81 = arith.constant 0 : index
      %128 = vector.load %arg4[%c1_79, %c0_80, %c0_81] : memref<9x6x16xf32, #tpu.memory_space<vmem>>, vector<1x6x16xf32>
      %129 = vector.shape_cast %128 : vector<1x6x16xf32> to vector<6x16xf32>
      %cst_82 = arith.constant dense<0.000000e+00> : vector<11x16xf32>
      %130 = tpu.matmul %127, %129, %cst_82 {dimension_numbers = #tpu.dot_dimension_numbers<[1], [0], [0], [1], [0, 0, 1, 1], [], []>} : vector<11x6xf32>, vector<6x16xf32>, vector<11x16xf32> -> vector<11x16xf32>
      %131 = arith.addf %126, %130 : vector<11x16xf32>
      %132 = vector.extract_strided_slice %121 {offsets = [2, 0], sizes = [11, 6], strides = [1, 1]} : vector<13x6xf32> to vector<11x6xf32>
      %c2_83 = arith.constant 2 : index
      %c0_84 = arith.constant 0 : index
      %c0_85 = arith.constant 0 : index
      %133 = vector.load %arg4[%c2_83, %c0_84, %c0_85] : memref<9x6x16xf32, #tpu.memory_space<vmem>>, vector<1x6x16xf32>
      %134 = vector.shape_cast %133 : vector<1x6x16xf32> to vector<6x16xf32>
      %cst_86 = arith.constant dense<0.000000e+00> : vector<11x16xf32>
      %135 = tpu.matmul %132, %134, %cst_86 {dimension_numbers = #tpu.dot_dimension_numbers<[1], [0], [0], [1], [0, 0, 1, 1], [], []>} : vector<11x6xf32>, vector<6x16xf32>, vector<11x16xf32> -> vector<11x16xf32>
      %136 = arith.addf %131, %135 : vector<11x16xf32>
      %c1_i32_87 = arith.constant 1 : i32
      %137 = arith.addi %117, %c1_i32_87 : i32
      %138 = arith.index_cast %137 : i32 to index
      %c0_88 = arith.constant 0 : index
      %c0_89 = arith.constant 0 : index
      %139 = vector.load %arg13[%138, %c0_88, %c0_89] : memref<13x13x6xf32, #tpu.memory_space<vmem>>, vector<1x13x6xf32>
      %140 = vector.shape_cast %139 : vector<1x13x6xf32> to vector<13x6xf32>
      %141 = vector.extract_strided_slice %140 {offsets = [0, 0], sizes = [11, 6], strides = [1, 1]} : vector<13x6xf32> to vector<11x6xf32>
      %c3_90 = arith.constant 3 : index
      %c0_91 = arith.constant 0 : index
      %c0_92 = arith.constant 0 : index
      %142 = vector.load %arg4[%c3_90, %c0_91, %c0_92] : memref<9x6x16xf32, #tpu.memory_space<vmem>>, vector<1x6x16xf32>
      %143 = vector.shape_cast %142 : vector<1x6x16xf32> to vector<6x16xf32>
      %cst_93 = arith.constant dense<0.000000e+00> : vector<11x16xf32>
      %144 = tpu.matmul %141, %143, %cst_93 {dimension_numbers = #tpu.dot_dimension_numbers<[1], [0], [0], [1], [0, 0, 1, 1], [], []>} : vector<11x6xf32>, vector<6x16xf32>, vector<11x16xf32> -> vector<11x16xf32>
      %145 = arith.addf %136, %144 : vector<11x16xf32>
      %146 = vector.extract_strided_slice %140 {offsets = [1, 0], sizes = [11, 6], strides = [1, 1]} : vector<13x6xf32> to vector<11x6xf32>
      %c4_94 = arith.constant 4 : index
      %c0_95 = arith.constant 0 : index
      %c0_96 = arith.constant 0 : index
      %147 = vector.load %arg4[%c4_94, %c0_95, %c0_96] : memref<9x6x16xf32, #tpu.memory_space<vmem>>, vector<1x6x16xf32>
      %148 = vector.shape_cast %147 : vector<1x6x16xf32> to vector<6x16xf32>
      %cst_97 = arith.constant dense<0.000000e+00> : vector<11x16xf32>
      %149 = tpu.matmul %146, %148, %cst_97 {dimension_numbers = #tpu.dot_dimension_numbers<[1], [0], [0], [1], [0, 0, 1, 1], [], []>} : vector<11x6xf32>, vector<6x16xf32>, vector<11x16xf32> -> vector<11x16xf32>
      %150 = arith.addf %145, %149 : vector<11x16xf32>
      %151 = vector.extract_strided_slice %140 {offsets = [2, 0], sizes = [11, 6], strides = [1, 1]} : vector<13x6xf32> to vector<11x6xf32>
      %c5_98 = arith.constant 5 : index
      %c0_99 = arith.constant 0 : index
      %c0_100 = arith.constant 0 : index
      %152 = vector.load %arg4[%c5_98, %c0_99, %c0_100] : memref<9x6x16xf32, #tpu.memory_space<vmem>>, vector<1x6x16xf32>
      %153 = vector.shape_cast %152 : vector<1x6x16xf32> to vector<6x16xf32>
      %cst_101 = arith.constant dense<0.000000e+00> : vector<11x16xf32>
      %154 = tpu.matmul %151, %153, %cst_101 {dimension_numbers = #tpu.dot_dimension_numbers<[1], [0], [0], [1], [0, 0, 1, 1], [], []>} : vector<11x6xf32>, vector<6x16xf32>, vector<11x16xf32> -> vector<11x16xf32>
      %155 = arith.addf %150, %154 : vector<11x16xf32>
      %c2_i32_102 = arith.constant 2 : i32
      %156 = arith.addi %117, %c2_i32_102 : i32
      %157 = arith.index_cast %156 : i32 to index
      %c0_103 = arith.constant 0 : index
      %c0_104 = arith.constant 0 : index
      %158 = vector.load %arg13[%157, %c0_103, %c0_104] : memref<13x13x6xf32, #tpu.memory_space<vmem>>, vector<1x13x6xf32>
      %159 = vector.shape_cast %158 : vector<1x13x6xf32> to vector<13x6xf32>
      %160 = vector.extract_strided_slice %159 {offsets = [0, 0], sizes = [11, 6], strides = [1, 1]} : vector<13x6xf32> to vector<11x6xf32>
      %c6_105 = arith.constant 6 : index
      %c0_106 = arith.constant 0 : index
      %c0_107 = arith.constant 0 : index
      %161 = vector.load %arg4[%c6_105, %c0_106, %c0_107] : memref<9x6x16xf32, #tpu.memory_space<vmem>>, vector<1x6x16xf32>
      %162 = vector.shape_cast %161 : vector<1x6x16xf32> to vector<6x16xf32>
      %cst_108 = arith.constant dense<0.000000e+00> : vector<11x16xf32>
      %163 = tpu.matmul %160, %162, %cst_108 {dimension_numbers = #tpu.dot_dimension_numbers<[1], [0], [0], [1], [0, 0, 1, 1], [], []>} : vector<11x6xf32>, vector<6x16xf32>, vector<11x16xf32> -> vector<11x16xf32>
      %164 = arith.addf %155, %163 : vector<11x16xf32>
      %165 = vector.extract_strided_slice %159 {offsets = [1, 0], sizes = [11, 6], strides = [1, 1]} : vector<13x6xf32> to vector<11x6xf32>
      %c7_109 = arith.constant 7 : index
      %c0_110 = arith.constant 0 : index
      %c0_111 = arith.constant 0 : index
      %166 = vector.load %arg4[%c7_109, %c0_110, %c0_111] : memref<9x6x16xf32, #tpu.memory_space<vmem>>, vector<1x6x16xf32>
      %167 = vector.shape_cast %166 : vector<1x6x16xf32> to vector<6x16xf32>
      %cst_112 = arith.constant dense<0.000000e+00> : vector<11x16xf32>
      %168 = tpu.matmul %165, %167, %cst_112 {dimension_numbers = #tpu.dot_dimension_numbers<[1], [0], [0], [1], [0, 0, 1, 1], [], []>} : vector<11x6xf32>, vector<6x16xf32>, vector<11x16xf32> -> vector<11x16xf32>
      %169 = arith.addf %164, %168 : vector<11x16xf32>
      %170 = vector.extract_strided_slice %159 {offsets = [2, 0], sizes = [11, 6], strides = [1, 1]} : vector<13x6xf32> to vector<11x6xf32>
      %c8_113 = arith.constant 8 : index
      %c0_114 = arith.constant 0 : index
      %c0_115 = arith.constant 0 : index
      %171 = vector.load %arg4[%c8_113, %c0_114, %c0_115] : memref<9x6x16xf32, #tpu.memory_space<vmem>>, vector<1x6x16xf32>
      %172 = vector.shape_cast %171 : vector<1x6x16xf32> to vector<6x16xf32>
      %cst_116 = arith.constant dense<0.000000e+00> : vector<11x16xf32>
      %173 = tpu.matmul %170, %172, %cst_116 {dimension_numbers = #tpu.dot_dimension_numbers<[1], [0], [0], [1], [0, 0, 1, 1], [], []>} : vector<11x6xf32>, vector<6x16xf32>, vector<11x16xf32> -> vector<11x16xf32>
      %174 = arith.addf %169, %173 : vector<11x16xf32>
      %cst_117 = arith.constant 0.000000e+00 : f32
      %175 = vector.broadcast %cst_117 : f32 to vector<11x16xf32>
      %176 = arith.maximumf %174, %175 : vector<11x16xf32>
      %177 = arith.maximumf %115, %176 : vector<11x16xf32>
      %cst_118 = arith.constant dense<0.000000e+00> : vector<5x16xf32>
      %178 = tpu.matmul %20, %177, %cst_118 {dimension_numbers = #tpu.dot_dimension_numbers<[1], [0], [0], [1], [0, 0, 1, 1], [], []>} : vector<5x11xf32>, vector<11x16xf32>, vector<5x16xf32> -> vector<5x16xf32>
      %cst_119 = arith.constant dense<0.000000e+00> : vector<5x16xf32>
      %179 = tpu.matmul %27, %177, %cst_119 {dimension_numbers = #tpu.dot_dimension_numbers<[1], [0], [0], [1], [0, 0, 1, 1], [], []>} : vector<5x11xf32>, vector<11x16xf32>, vector<5x16xf32> -> vector<5x16xf32>
      %180 = arith.maximumf %178, %179 : vector<5x16xf32>
      %181 = vector.extract_strided_slice %180 {offsets = [0, 0], sizes = [1, 16], strides = [1, 1]} : vector<5x16xf32> to vector<1x16xf32>
      %c5_i32_120 = arith.constant 5 : i32
      %182 = arith.muli %arg14, %c5_i32_120 : i32
      %c0_i32_121 = arith.constant 0 : i32
      %183 = arith.addi %182, %c0_i32_121 : i32
      %184 = arith.index_cast %183 : i32 to index
      %c0_122 = arith.constant 0 : index
      %c0_123 = arith.constant 0 : index
      %185 = vector.load %arg6[%184, %c0_122, %c0_123] : memref<25x16x120xf32, #tpu.memory_space<vmem>>, vector<1x16x120xf32>
      %186 = vector.shape_cast %185 : vector<1x16x120xf32> to vector<16x120xf32>
      %cst_124 = arith.constant dense<0.000000e+00> : vector<1x120xf32>
      %187 = tpu.matmul %181, %186, %cst_124 {dimension_numbers = #tpu.dot_dimension_numbers<[1], [0], [0], [1], [0, 0, 1, 1], [], []>} : vector<1x16xf32>, vector<16x120xf32>, vector<1x120xf32> -> vector<1x120xf32>
      %188 = arith.addf %arg15, %187 : vector<1x120xf32>
      %189 = vector.extract_strided_slice %180 {offsets = [1, 0], sizes = [1, 16], strides = [1, 1]} : vector<5x16xf32> to vector<1x16xf32>
      %c5_i32_125 = arith.constant 5 : i32
      %190 = arith.muli %arg14, %c5_i32_125 : i32
      %c1_i32_126 = arith.constant 1 : i32
      %191 = arith.addi %190, %c1_i32_126 : i32
      %192 = arith.index_cast %191 : i32 to index
      %c0_127 = arith.constant 0 : index
      %c0_128 = arith.constant 0 : index
      %193 = vector.load %arg6[%192, %c0_127, %c0_128] : memref<25x16x120xf32, #tpu.memory_space<vmem>>, vector<1x16x120xf32>
      %194 = vector.shape_cast %193 : vector<1x16x120xf32> to vector<16x120xf32>
      %cst_129 = arith.constant dense<0.000000e+00> : vector<1x120xf32>
      %195 = tpu.matmul %189, %194, %cst_129 {dimension_numbers = #tpu.dot_dimension_numbers<[1], [0], [0], [1], [0, 0, 1, 1], [], []>} : vector<1x16xf32>, vector<16x120xf32>, vector<1x120xf32> -> vector<1x120xf32>
      %196 = arith.addf %188, %195 : vector<1x120xf32>
      %197 = vector.extract_strided_slice %180 {offsets = [2, 0], sizes = [1, 16], strides = [1, 1]} : vector<5x16xf32> to vector<1x16xf32>
      %c5_i32_130 = arith.constant 5 : i32
      %198 = arith.muli %arg14, %c5_i32_130 : i32
      %c2_i32_131 = arith.constant 2 : i32
      %199 = arith.addi %198, %c2_i32_131 : i32
      %200 = arith.index_cast %199 : i32 to index
      %c0_132 = arith.constant 0 : index
      %c0_133 = arith.constant 0 : index
      %201 = vector.load %arg6[%200, %c0_132, %c0_133] : memref<25x16x120xf32, #tpu.memory_space<vmem>>, vector<1x16x120xf32>
      %202 = vector.shape_cast %201 : vector<1x16x120xf32> to vector<16x120xf32>
      %cst_134 = arith.constant dense<0.000000e+00> : vector<1x120xf32>
      %203 = tpu.matmul %197, %202, %cst_134 {dimension_numbers = #tpu.dot_dimension_numbers<[1], [0], [0], [1], [0, 0, 1, 1], [], []>} : vector<1x16xf32>, vector<16x120xf32>, vector<1x120xf32> -> vector<1x120xf32>
      %204 = arith.addf %196, %203 : vector<1x120xf32>
      %205 = vector.extract_strided_slice %180 {offsets = [3, 0], sizes = [1, 16], strides = [1, 1]} : vector<5x16xf32> to vector<1x16xf32>
      %c5_i32_135 = arith.constant 5 : i32
      %206 = arith.muli %arg14, %c5_i32_135 : i32
      %c3_i32 = arith.constant 3 : i32
      %207 = arith.addi %206, %c3_i32 : i32
      %208 = arith.index_cast %207 : i32 to index
      %c0_136 = arith.constant 0 : index
      %c0_137 = arith.constant 0 : index
      %209 = vector.load %arg6[%208, %c0_136, %c0_137] : memref<25x16x120xf32, #tpu.memory_space<vmem>>, vector<1x16x120xf32>
      %210 = vector.shape_cast %209 : vector<1x16x120xf32> to vector<16x120xf32>
      %cst_138 = arith.constant dense<0.000000e+00> : vector<1x120xf32>
      %211 = tpu.matmul %205, %210, %cst_138 {dimension_numbers = #tpu.dot_dimension_numbers<[1], [0], [0], [1], [0, 0, 1, 1], [], []>} : vector<1x16xf32>, vector<16x120xf32>, vector<1x120xf32> -> vector<1x120xf32>
      %212 = arith.addf %204, %211 : vector<1x120xf32>
      %213 = vector.extract_strided_slice %180 {offsets = [4, 0], sizes = [1, 16], strides = [1, 1]} : vector<5x16xf32> to vector<1x16xf32>
      %c5_i32_139 = arith.constant 5 : i32
      %214 = arith.muli %arg14, %c5_i32_139 : i32
      %c4_i32 = arith.constant 4 : i32
      %215 = arith.addi %214, %c4_i32 : i32
      %216 = arith.index_cast %215 : i32 to index
      %c0_140 = arith.constant 0 : index
      %c0_141 = arith.constant 0 : index
      %217 = vector.load %arg6[%216, %c0_140, %c0_141] : memref<25x16x120xf32, #tpu.memory_space<vmem>>, vector<1x16x120xf32>
      %218 = vector.shape_cast %217 : vector<1x16x120xf32> to vector<16x120xf32>
      %cst_142 = arith.constant dense<0.000000e+00> : vector<1x120xf32>
      %219 = tpu.matmul %213, %218, %cst_142 {dimension_numbers = #tpu.dot_dimension_numbers<[1], [0], [0], [1], [0, 0, 1, 1], [], []>} : vector<1x16xf32>, vector<16x120xf32>, vector<1x120xf32> -> vector<1x120xf32>
      %220 = arith.addf %212, %219 : vector<1x120xf32>
      scf.yield %220 : vector<1x120xf32>
    }
    %c5_i32_15 = arith.constant 5 : i32
    %cst_16 = arith.constant 0.000000e+00 : f32
    %41 = vector.broadcast %cst_16 : f32 to vector<1x120xf32>
    %42 = arith.maximumf %40, %41 : vector<1x120xf32>
    %c0_17 = arith.constant 0 : index
    %c0_18 = arith.constant 0 : index
    %43 = vector.load %arg8[%c0_17, %c0_18] : memref<120x84xf32, #tpu.memory_space<vmem>>, vector<120x84xf32>
    %cst_19 = arith.constant dense<0.000000e+00> : vector<1x84xf32>
    %44 = tpu.matmul %42, %43, %cst_19 {dimension_numbers = #tpu.dot_dimension_numbers<[1], [0], [0], [1], [0, 0, 1, 1], [], []>} : vector<1x120xf32>, vector<120x84xf32>, vector<1x84xf32> -> vector<1x84xf32>
    %c0_20 = arith.constant 0 : index
    %c0_21 = arith.constant 0 : index
    %45 = vector.load %arg9[%c0_20, %c0_21] : memref<1x84xf32, #tpu.memory_space<vmem>>, vector<1x84xf32>
    %46 = arith.addf %44, %45 : vector<1x84xf32>
    %cst_22 = arith.constant 0.000000e+00 : f32
    %47 = vector.broadcast %cst_22 : f32 to vector<1x84xf32>
    %48 = arith.maximumf %46, %47 : vector<1x84xf32>
    %c0_23 = arith.constant 0 : index
    %c0_24 = arith.constant 0 : index
    %49 = vector.load %arg10[%c0_23, %c0_24] : memref<84x10xf32, #tpu.memory_space<vmem>>, vector<84x10xf32>
    %cst_25 = arith.constant dense<0.000000e+00> : vector<1x10xf32>
    %50 = tpu.matmul %48, %49, %cst_25 {dimension_numbers = #tpu.dot_dimension_numbers<[1], [0], [0], [1], [0, 0, 1, 1], [], []>} : vector<1x84xf32>, vector<84x10xf32>, vector<1x10xf32> -> vector<1x10xf32>
    %c0_26 = arith.constant 0 : index
    %c0_27 = arith.constant 0 : index
    %51 = vector.load %arg11[%c0_26, %c0_27] : memref<1x10xf32, #tpu.memory_space<vmem>>, vector<1x10xf32>
    %52 = arith.addf %50, %51 : vector<1x10xf32>
    %c0_28 = arith.constant 0 : index
    %c0_29 = arith.constant 0 : index
    %c0_30 = arith.constant 0 : index
    %53 = vector.load %arg12[%c0_28, %c0_29, %c0_30] : memref<1x1x10xf32, #tpu.memory_space<vmem>>, vector<1x1x10xf32>
    %54 = vector.shape_cast %53 : vector<1x1x10xf32> to vector<1x10xf32>
    %55 = vector.shape_cast %52 : vector<1x10xf32> to vector<1x1x10xf32>
    tpu.vector_store %arg12[%c0_28, %c0_29, %c0_30], %55 {strides = array<i32>} : memref<1x1x10xf32, #tpu.memory_space<vmem>>, vector<1x1x10xf32>,
    return
  }
  func.func @transform_0(%arg0: i32) -> (i32, i32, i32, i32) {
    %c0_i32 = arith.constant 0 : i32
    %c0_i32_0 = arith.constant 0 : i32
    %c0_i32_1 = arith.constant 0 : i32
    %c0_i32_2 = arith.constant 0 : i32
    return %arg0, %c0_i32, %c0_i32_0, %c0_i32_1 : i32, i32, i32, i32
  }
  func.func @transform_1(%arg0: i32) -> (i32, i32) {
    %c0_i32 = arith.constant 0 : i32
    %c0_i32_0 = arith.constant 0 : i32
    %c0_i32_1 = arith.constant 0 : i32
    return %c0_i32, %c0_i32_0 : i32, i32
  }
  func.func @transform_2(%arg0: i32) -> (i32, i32) {
    %c0_i32 = arith.constant 0 : i32
    %c0_i32_0 = arith.constant 0 : i32
    %c0_i32_1 = arith.constant 0 : i32
    return %c0_i32, %c0_i32_0 : i32, i32
  }
  func.func @transform_3(%arg0: i32) -> (i32, i32, i32) {
    %c0_i32 = arith.constant 0 : i32
    %c0_i32_0 = arith.constant 0 : i32
    %c0_i32_1 = arith.constant 0 : i32
    %c0_i32_2 = arith.constant 0 : i32
    return %c0_i32, %c0_i32_0, %c0_i32_1 : i32, i32, i32
  }
  func.func @transform_4(%arg0: i32) -> (i32, i32) {
    %c0_i32 = arith.constant 0 : i32
    %c0_i32_0 = arith.constant 0 : i32
    %c0_i32_1 = arith.constant 0 : i32
    return %c0_i32, %c0_i32_0 : i32, i32
  }
  func.func @transform_5(%arg0: i32) -> (i32, i32, i32) {
    %c0_i32 = arith.constant 0 : i32
    %c0_i32_0 = arith.constant 0 : i32
    %c0_i32_1 = arith.constant 0 : i32
    %c0_i32_2 = arith.constant 0 : i32
    return %c0_i32, %c0_i32_0, %c0_i32_1 : i32, i32, i32
  }
  func.func @transform_6(%arg0: i32) -> (i32, i32) {
    %c0_i32 = arith.constant 0 : i32
    %c0_i32_0 = arith.constant 0 : i32
    %c0_i32_1 = arith.constant 0 : i32
    return %c0_i32, %c0_i32_0 : i32, i32
  }
  func.func @transform_7(%arg0: i32) -> (i32, i32) {
    %c0_i32 = arith.constant 0 : i32
    %c0_i32_0 = arith.constant 0 : i32
    %c0_i32_1 = arith.constant 0 : i32
    return %c0_i32, %c0_i32_0 : i32, i32
  }
  func.func @transform_8(%arg0: i32) -> (i32, i32) {
    %c0_i32 = arith.constant 0 : i32
    %c0_i32_0 = arith.constant 0 : i32
    %c0_i32_1 = arith.constant 0 : i32
    return %c0_i32, %c0_i32_0 : i32, i32
  }
  func.func @transform_9(%arg0: i32) -> (i32, i32) {
    %c0_i32 = arith.constant 0 : i32
    %c0_i32_0 = arith.constant 0 : i32
    %c0_i32_1 = arith.constant 0 : i32
    return %c0_i32, %c0_i32_0 : i32, i32
  }
  func.func @transform_10(%arg0: i32) -> (i32, i32) {
    %c0_i32 = arith.constant 0 : i32
    %c0_i32_0 = arith.constant 0 : i32
    %c0_i32_1 = arith.constant 0 : i32
    return %c0_i32, %c0_i32_0 : i32, i32
  }
  func.func @transform_11(%arg0: i32) -> (i32, i32, i32) {
    %c0_i32 = arith.constant 0 : i32
    %c0_i32_0 = arith.constant 0 : i32
    %c0_i32_1 = arith.constant 0 : i32
    return %arg0, %c0_i32, %c0_i32_0 : i32, i32, i32
  }
}

</mosaic_0001>

<bundles_post_ra>
// kernel: lenet_forward.1
= control target key start
LH: loop header
LB: loop body
LE: loop exit
PB: predicated region body
PF: predicated region fallthrough
CT: control target
= control target key end

     0   :  { %s5124_s0 = inlined_call_operand.vmem [shape: f32[2,28,28,1], index: 0, kind: input, shape index: {}]   ;;  %s5125_s1 = inlined_call_operand.vmem [shape: f32[9,6], index: 1, kind: input, shape index: {}]   ;;  %s5126_s2 = inlined_call_operand.vmem [shape: f32[1,6], index: 2, kind: input, shape index: {}]   ;;  %s5127_s3 = inlined_call_operand.vmem [shape: f32[9,6,16], index: 3, kind: input, shape index: {}]   ;;  %s5128_s4 = inlined_call_operand.vmem [shape: f32[1,16], index: 4, kind: input, shape index: {}]   ;;  %s5129_s5 = inlined_call_operand.vmem [shape: f32[25,16,120], index: 5, kind: input, shape index: {}]   ;;  %s5130_s6 = inlined_call_operand.vmem [shape: f32[1,120], index: 6, kind: input, shape index: {}]   ;;  %s5131_s7 = inlined_call_operand.vmem [shape: f32[120,84], index: 7, kind: input, shape index: {}]   ;;  %s5132_s8 = inlined_call_operand.vmem [shape: f32[1,84], index: 8, kind: input, shape index: {}]   ;;  %s5133_s9 = inlined_call_operand.vmem [shape: f32[84,10], index: 9, kind: input, shape index: {}]   ;;  %s5134_s10 = inlined_call_operand.vmem [shape: f32[1,10], index: 10, kind: input, shape index: {}]   ;;  %s5135_s11 = inlined_call_operand.hbm [shape: f32[2,1,10], index: 11, kind: output, shape index: {}]  }
   0x1   :  { %5143 = sst [smem:[#allocation6_spill]] %s5124_s0 }
   0x2   :  { %5144 = sst [smem:[#allocation7_spill]] %s5125_s1 }
   0x3   :  { %16 = vsyncpa [#allocation4], 0 }
   0x4   :  { %18 = vsyncpa [#allocation4 + $0x1], 0  ;;  %s4335_s17 = smov 0   ;;  %s4337_s18 = smov 0  }
   0x5   :  { %s4339_s19 = smov 0   ;;  %s4341_s20 = smov 0  }
   0x6 LB: > { %s4356_s21 = sadd.s32 4294967295, %s4251_s20   ;;  %s3493_s22 = sadd.s32 4294967294, %s4251_s20   ;;  %s4251_s20 = sphi %s4341_s20, %s5178_s20   ;;  %s4247_s19 = sphi %s4339_s19, %s5177_s19   ;;  %s4243_s18 = sphi %s4337_s18, %s5176_s18   ;;  %s4239_s17 = sphi %s4335_s17, %s5175_s17  }
   0x7   : > { %s4360_s23 = sadd.s32 1, %s4251_s20   ;;  %s267_s24 = sadd.s32 1, %s4247_s19 }
   0x8   : > { %s264_s25 = ssub.s32 %s4251_s20, %s4360_s23  ;;  %p277_p0 = scmp.ne.s32.totalorder %s4247_s19, %s4243_s18 }
   0x9   : > { %p265_p1 = scmp.eq.s32.totalorder %s264_s25, 0  ;;  %p278_p2 = scmp.eq.s32.totalorder %s4356_s21, 1 }
   0xa   : > { %p283_p3 = scmp.ne.s32.totalorder %s4243_s18, %s4239_s17  ;;  %p284_p4 = scmp.eq.s32.totalorder %s3493_s22, 1 }
   0xb   : > { %s4371_s26 = scalar_select %p265_p1, %s4247_s19, %s267_s24  }
   0xc   : > { %p4373_p5 = por %p278_p2, %p277_p0  ;;  %p4377_p6 = por %p284_p4, %p283_p3 }
   0xd   : > { %p3496_p7 = scmp.ge.s32.totalorder %s4251_s20, 1  ;;  %p340_p8 = scmp.lt.s32.totalorder %s4251_s20, 3 }
   0xf   : > { %p341_p9 = pnand %p3496_p7, %p340_p8 }
  0x10   : > { %s5142_s29 = sand.u32 (!%p341_p9), 1, %s4243_s18   ;;  %p379_p10 = scmp.lt.s32.totalorder (!%p341_p9), %s4356_s21, 1  ;;  %v384_v0 = vlaneseq (!%p341_p9)  ;;  %v4398_v3 = vld [vmem:[%s5126_s2] ss:$0 sm:$0xff] (!%p341_p9)  ;;  %v5136_v11 = vmov (!%p341_p9), 0.0  }
  0x11   : > { %344 = sbr.rel (%p341_p9) target bundleno = 1693 (0x69d), region = 64  ;;  %s5147_s1 = sld [smem:[#allocation7_spill]] (!%p341_p9)  ;;  %v4403_v4 = vld [vmem:[%s5128_s4] ss:$0 sm:$0xff] (!%p341_p9) }
  0x12   : > { %v4406_v5 = vshrl.u32 (!%p341_p9), %v384_v0, 7  ;;  %v388_v6 = vand.u32 (!%p341_p9), 127, %v384_v0  ;;  %s5148_s0 = sld [smem:[#allocation6_spill]] (!%p341_p9)  ;;  %s4429_s15 = scalar_lea.vmem (!%p341_p9), [#allocation3], %s5142_s29 }
  0x13   : > { %s4431_s16 = smov (!%p341_p9), 0  }
  0x14   : > { %v386_v7 = vadd.s32 (!%p341_p9), 8, %v4406_v5  ;;  %v389_v8 = vmul.u32 (!%p341_p9), 2, %v4406_v5 }
  0x16   : > { %v390_v9 = vmul.u32 (!%p341_p9), 2, %v386_v7  ;;  %vm391_vm0 = vcmp.eq.s32.totalorder (!%p341_p9), %v388_v6, %v389_v8  ;;  %v397_v10 = vadd.s32 (!%p341_p9), 1, %v389_v8 }
  0x17   : > { %v4388_v1 = vld [vmem:[%s5147_s1] sm:$0xff] (!%p341_p9)  ;;  %v4393_v2 = vld [vmem:[%s5147_s1 + $0x8] ss:$0 sm:$0xff] (!%p341_p9)  ;;  %v4416_v12 = vsel (!%p341_p9), %vm391_vm0, 1.0, %v5136_v11 }
  0x18   : > { %s380_s25 = scalar_select %p379_p10, %s4356_s21, 1  ;;  %vm392_vm1 = vcmp.eq.s32.totalorder %v388_v6, %v390_v9  ;;  %v398_v13 = vadd.s32 1, %v390_v9  ;;  %vm399_vm2 = vcmp.eq.s32.totalorder %v388_v6, %v397_v10 }
  0x19   : > { %v4419_v14 = vsel %vm392_vm1, 1.0, %v5136_v11  ;;  %v4422_v15 = vsel %vm399_vm2, 1.0, %v5136_v11 }
  0x1a   : > { %s4102_s30 = smul.u32 896, %s380_s25  ;;  %vm400_vm3 = vcmp.eq.s32.totalorder %v388_v6, %v398_v13 }
  0x1b   : > { %v4425_v16 = vsel %vm400_vm3, 1.0, %v5136_v11 }
  0x1c   : > { %s4413_s14 = scalar_lea.vmem %s5148_s0, %s4102_s30 }
  0x1d LB: >> { %v4266_v17 = vmov 0   ;;  %s3636_s22 = sshll.u32 %s4255_s16, 6  ;;  %vm909_vm4 = vcmask 211968   ;;  %v456_v34 = vsub.s32 0, %v4406_v5  ;;  %v468_v35 = vsub.s32 1, %v4406_v5  ;;  %s3531_s25 = sshll.u32 %s4255_s16, 4  ;;  %s4255_s16 = sphi %s4431_s16, %s426_s16  }
  0x1e   : >> { %4176 = vset.pattern.permute.xlu1 %v4266_v17  ;;  %4175 = vset.pattern.permute.xlu0 %v4266_v17  ;;  %s429_s24 = scalar_lea.vmem %s4413_s14, %s3636_s22  ;;  %v496_v36 = vsub.s32 2, %v4406_v5  ;;  %v563_v37 = vsub.s32 4, %v4406_v5  ;;  %v590_v38 = vsub.s32 5, %v4406_v5  ;;  %v551_v40 = vsub.s32 3, %v4406_v5  ;;  %s1079_s30 = scalar_lea.vmem [#allocation2], %s3531_s25 }
  0x1f   : >> { %v432_v18 = vld [vmem:[%s429_s24 + $0x10] sm:$0xff]  ;;  %v430_v19 = vld [vmem:[%s429_s24] sm:$0xff]  ;;  %v431_v21 = vld [vmem:[%s429_s24 + $0x8] sm:$0xff]  ;;  %3767 = vmatprep.mubr.msk.f32.mxu0 %vm909_vm4, %v4416_v12  ;;  %3778 = vmatprep.mubr.msk.f32.mxu1 %vm909_vm4, %v4422_v15  ;;  %v4448_v39 = vrot.slane %v4388_v1, %v456_v34  ;;  %v4452_v41 = vrot.slane %v4388_v1, %v468_v35  ;;  %v644_v46 = vsub.s32 6, %v4406_v5  ;;  %v656_v47 = vsub.s32 7, %v4406_v5  ;;  %s426_s16 = sadd.s32 1, %s4255_s16  }
  0x20   : >> { %446 = vperm.xlu1 %4176, %v432_v18   ;;  %436 = vperm.xlu0 %4175, %v430_v19   ;;  %v3508_v20 = vld [vmem:[%s429_s24 + $0x20] sm:$0xff]  ;;  %v3510_v22 = vld [vmem:[%s429_s24 + $0x30] sm:$0xff]  ;;  %v3509_v23 = vld [vmem:[%s429_s24 + $0x28] sm:$0xff]  ;;  %v4455_v42 = vrot.slane %v4388_v1, %v496_v36  ;;  %v4458_v45 = vrot.slane %v4388_v1, %v563_v37  ;;  %v4470_v51 = vrot.slane %v4388_v1, %v590_v38  ;;  %vm478_vm5 = vcmask 1046528   ;;  %p423_p11 = scmp.ge.s32.totalorder %s426_s16, 13  }
  0x21   : >> { %v3511_v24 = vld [vmem:[%s429_s24 + $0x38] sm:$0xf]  ;;  %v3515_v26 = vld [vmem:[%s429_s24 + $0x48] sm:$0xff]  ;;  %v3514_v27 = vld [vmem:[%s429_s24 + $0x40] sm:$0xff]  ;;  %v4474_v53 = vrot.slane %v4388_v1, %v551_v40  ;;  %vm506_vm6 = vcmask 1045504   ;;  %v4483_v60 = vrot.slane %v4388_v1, %v644_v46  ;;  %v4486_v61 = vrot.slane %v4388_v1, %v656_v47  ;;  %s4802_s22 = smov (%p423_p11), 0  }
  0x22   : >> { %v433_v25 = vld [vmem:[%s429_s24 + $0x18] sm:$0xf]  ;;  %v3516_v29 = vld [vmem:[%s429_s24 + $0x50] sm:$0xff]  ;;  %v3522_v30 = vld [vmem:[%s429_s24 + $0x68] sm:$0xff]  ;;  %vm916_vm7 = vcmask 1041408   ;;  %vm4267_vm8 = vmmov 1  }
  0x23   : >> { %v3517_v28 = vld [vmem:[%s429_s24 + $0x58] sm:$0xf]  ;;  %v3521_v31 = vld [vmem:[%s429_s24 + $0x60] sm:$0xff]  ;;  %v3523_v33 = vld [vmem:[%s429_s24 + $0x70] sm:$0xff]  ;;  %vm1082_vm10 = vcmask 45056   ;;  %vm1080_vm11 = vcmask 48128  }
  0x24   : >> { %531 = vperm.xlu1 %4176, %v3508_v20   ;;  %441 = vperm.xlu0 %4175, %v431_v21   ;;  %v3524_v32 = vld [vmem:[%s429_s24 + $0x78] sm:$0xf]  ;;  %vm3983_vm9 = vmpackc.low %vm916_vm7, %vm4267_vm8 }
  0x28   : >> { %541 = vperm.xlu1 %4176, %v3510_v22   ;;  %536 = vperm.xlu0 %4175, %v3509_v23  }
  0x2c   : >> { %546 = vperm.xlu1 %4176, %v3511_v24   ;;  %451 = vperm.xlu0 %4175, %v433_v25  }
  0x30   : >> { %629 = vperm.xlu1 %4176, %v3515_v26   ;;  %624 = vperm.xlu0 %4175, %v3514_v27  }
  0x34   : >> { %639 = vperm.xlu1 %4176, %v3517_v28   ;;  %634 = vperm.xlu0 %4175, %v3516_v29  }
  0x38   : >> { %834 = vperm.xlu1 %4176, %v3522_v30   ;;  %829 = vperm.xlu0 %4175, %v3521_v31  }
  0x3c   : >> { %844 = vperm.xlu1 %4176, %v3524_v32   ;;  %839 = vperm.xlu0 %4175, %v3523_v33  }
  0x9f   : >> { %v447_v43 = vpop.permute.xlu1 %446  ;;  %v437_v44 = vpop.permute.xlu0 %436 }
  0xa0   : >> { %v460_v48 = vmul.f32 %v4448_v39, %v447_v43  ;;  %v4464_v49 = vmul.f32 %v4452_v41, %v447_v43  ;;  %v4467_v50 = vmul.f32 %v4455_v42, %v447_v43  ;;  %v458_v52 = vmul.f32 %v4448_v39, %v437_v44 }
  0xa1   : >> { %v470_v54 = vmul.f32 %v4452_v41, %v437_v44  ;;  %v498_v55 = vmul.f32 %v4455_v42, %v437_v44 }
  0xa2   : >> { %v4479_v56 = vadd.f32 %v4398_v3, %v460_v48  ;;  %v482_v57 = vrot.slane %v4464_v49, 1  ;;  %v510_v62 = vrot.slane %v4467_v50, 2  ;;  %v462_v7 = vadd.f32 %v4398_v3, %v458_v52 }
  0xa3   : >> { %v532_v58 = vpop.permute.xlu1 %531  ;;  %v442_v59 = vpop.permute.xlu0 %441  ;;  %v479_v13 = vrot.slane %v470_v54, 1  ;;  %v507_v17 = vrot.slane %v498_v55, 2 }
  0xa4   : >> { %v4490_v63 = vmul.f32 %v4458_v45, %v532_v58  ;;  %v4493_v0 = vmul.f32 %v4470_v51, %v532_v58  ;;  %v712_v6 = vmul.f32 %v532_v58, %v4448_v39  ;;  %v4498_v8 = vmul.f32 %v532_v58, %v4452_v41 }
  0xa5   : >> { %v459_v9 = vmul.f32 %v4448_v39, %v442_v59  ;;  %v471_v10 = vmul.f32 %v4452_v41, %v442_v59  ;;  %v4503_v18 = vmul.f32 %v532_v58, %v4455_v42  ;;  %v499_v19 = vmul.f32 %v4455_v42, %v442_v59 }
  0xa6   : >> { %v553_v20 = vmul.f32 %v4474_v53, %v532_v58  ;;  %v573_v21 = vrot.slane %v4490_v63, 1  ;;  %v600_v25 = vrot.slane %v4493_v0, 2  ;;  %v4511_v26 = vadd.f32 %v4398_v3, %v712_v6 }
  0xa7   : >> { %v463_v22 = vadd.f32 %v4398_v3, %v459_v9  ;;  %v480_v23 = vrot.slane %v471_v10, 1  ;;  %v542_v24 = vpop.permute.xlu1 %541  ;;  %v508_v27 = vrot.slane %v499_v19, 2  ;;  %v537_v33 = vpop.permute.xlu0 %536 }
  0xa8   : >> { %v4514_v28 = vmul.f32 %v4458_v45, %v542_v24  ;;  %v4522_v32 = vmul.f32 %v542_v24, %v4452_v41  ;;  %v4526_v37 = vmul.f32 %v4474_v53, %v542_v24  ;;  %v594_v43 = vmul.f32 %v4470_v51, %v542_v24 }
  0xa9   : >> { %v481_v30 = vsel %vm478_vm5, %v479_v13, %v480_v23  ;;  %v483_v31 = vsel %vm478_vm5, %v480_v23, %v482_v57  ;;  %v509_v38 = vsel %vm506_vm6, %v507_v17, %v508_v27  ;;  %v511_v40 = vsel %vm506_vm6, %v508_v27, %v510_v62 }
  0xaa   : >> { %v490_v35 = vadd.f32 %v481_v30, %v462_v7  ;;  %v491_v36 = vadd.f32 %v483_v31, %v463_v22  ;;  %v714_v44 = vmul.f32 %v542_v24, %v4448_v39  ;;  %v576_v47 = vrot.slane %v4514_v28, 1 }
  0xab   : >> { %v5138_v48 = vrot.slane %v4522_v32, 1  ;;  %v554_v52 = vmul.f32 %v4474_v53, %v537_v33  ;;  %v547_v54 = vpop.permute.xlu1 %546  ;;  %v566_v55 = vmul.f32 %v4458_v45, %v537_v33  ;;  %v593_v58 = vmul.f32 %v4470_v51, %v537_v33 }
  0xac   : >> { %v519_v46 = vadd.f32 %v511_v40, %v491_v36  ;;  %v713_v59 = vmul.f32 %v537_v33, %v4448_v39  ;;  %v4541_v63 = vmul.f32 %v537_v33, %v4452_v41  ;;  %v518_v6 = vadd.f32 %v509_v38, %v490_v35  ;;  %v452_v36 = vpop.permute.xlu0 %451 }
  0xad   : >> { %v4544_v7 = vmul.f32 %v542_v24, %v4455_v42  ;;  %v4547_v10 = vmul.f32 %v537_v33, %v4455_v42  ;;  %v603_v13 = vrot.slane %v594_v43, 2  ;;  %v4550_v17 = vadd.f32 %v4398_v3, %v714_v44 }
  0xae   : >> { %v558_v9 = vadd.f32 %v554_v52, %v519_v46  ;;  %v574_v19 = vrot.slane %v566_v55, 1  ;;  %v729_v22 = vrot.slane %v4541_v63, 1  ;;  %v601_v23 = vrot.slane %v593_v58, 2 }
  0xaf   : >> { %v717_v27 = vadd.f32 %v4398_v3, %v713_v59  ;;  %v568_v28 = vmul.f32 %v4458_v45, %v547_v54  ;;  %v4556_v30 = vmul.f32 %v4470_v51, %v547_v54  ;;  %v715_v33 = vmul.f32 %v547_v54, %v4448_v39  ;;  %v630_v46 = vpop.permute.xlu1 %629 }
  0xb0   : >> { %v577_v24 = vsel %vm478_vm5, %v574_v19, %v576_v47  ;;  %v732_v31 = vsel %vm478_vm5, %v729_v22, %v5138_v48  ;;  %v4566_v35 = vmul.f32 %v547_v54, %v4452_v41  ;;  %v557_v38 = vadd.f32 %v553_v20, %v518_v6 }
  0xb1   : >> { %v5139_v40 = vrot.slane %v4544_v7, 2  ;;  %v585_v43 = vadd.f32 %v577_v24, %v558_v9  ;;  %v752_v44 = vrot.slane %v4547_v10, 2  ;;  %v575_v52 = vsel %vm478_vm5, %v573_v21, %v574_v19 }
  0xb2   : >> { %v605_v55 = vrot.slane %v4556_v30, 2  ;;  %v4573_v58 = vmul.f32 %v547_v54, %v4455_v42  ;;  %v578_v59 = vrot.slane %v568_v28, 1  ;;  %v4575_v11 = vadd.f32 %v732_v31, %v717_v27 }
  0xb3   : >> { %v461_v48 = vmul.f32 %v4448_v39, %v452_v36  ;;  %v473_v20 = vmul.f32 %v4452_v41, %v452_v36  ;;  %v501_v6 = vmul.f32 %v4455_v42, %v452_v36  ;;  %v4581_v9 = vadd.f32 %v4398_v3, %v715_v33  ;;  %v625_v36 = vpop.permute.xlu0 %624 }
  0xb4   : >> { %v604_v21 = vsel %vm506_vm6, %v601_v23, %v603_v13  ;;  %v647_v19 = vmul.f32 %v4483_v60, %v630_v46  ;;  %v556_v41 = vmul.f32 %v4474_v53, %v547_v54  ;;  %v579_v42 = vsel %vm478_vm5, %v576_v47, %v578_v59 }
  0xb5   : >> { %v465_v34 = vadd.f32 %v4398_v3, %v461_v48  ;;  %v484_v28 = vrot.slane %v473_v20, 1  ;;  %v512_v27 = vrot.slane %v501_v6, 2  ;;  %v612_v31 = vadd.f32 %v604_v21, %v585_v43 }
  0xb6   : >> { %v606_v33 = vsel %vm506_vm6, %v603_v13, %v605_v55  ;;  %v4597_v48 = vmul.f32 %v4486_v61, %v630_v46  ;;  %v4600_v43 = vmul.f32 %v4393_v2, %v630_v46  ;;  %v767_v13 = vmul.f32 %v630_v46, %v4474_v53 }
  0xb7   : >> { %v485_v24 = vsel %vm478_vm5, %v482_v57, %v484_v28  ;;  %v493_v29 = vadd.f32 %v484_v28, %v465_v34  ;;  %v513_v47 = vsel %vm506_vm6, %v510_v62, %v512_v27  ;;  %v775_v20 = vmul.f32 %v630_v46, %v4458_v45 }
  0xb8   : >> { %v492_v54 = vadd.f32 %v485_v24, %v4479_v56  ;;  %v4608_v6 = vadd.f32 %v647_v19, %v612_v31  ;;  %v4611_v57 = vmul.f32 %v630_v46, %v4470_v51  ;;  %v584_v34 = vadd.f32 %v575_v52, %v557_v38  ;;  %v4622_v24 = vpop.permute.xlu1 %639 }
  0xb9   : >> { %v521_v49 = vadd.f32 %v512_v27, %v493_v29  ;;  %v602_v56 = vsel %vm506_vm6, %v600_v25, %v601_v23  ;;  %v4617_v50 = vmul.f32 %v4486_v61, %v625_v36  ;;  %v4620_v62 = vmul.f32 %v4393_v2, %v625_v36  ;;  %v4629_v23 = vpop.permute.xlu0 %634 }
  0xba   : >> { %v520_v21 = vadd.f32 %v513_v47, %v492_v54  ;;  %v611_v28 = vadd.f32 %v602_v56, %v584_v34  ;;  %v646_v46 = vmul.f32 %v4483_v60, %v625_v36  ;;  %v783_v52 = vrot.slane %v775_v20, 1 }
  0xbb   : >> { %v560_v29 = vadd.f32 %v556_v41, %v521_v49  ;;  %v774_v25 = vmul.f32 %v625_v36, %v4458_v45  ;;  %v806_v31 = vrot.slane %v4611_v57, 2  ;;  %v766_v54 = vmul.f32 %v625_v36, %v4474_v53 }
  0xbc   : >> { %v559_v38 = vadd.f32 %v4526_v37, %v520_v21  ;;  %v797_v41 = vmul.f32 %v625_v36, %v4470_v51  ;;  %v4638_v37 = vmul.f32 %v4486_v61, %v4622_v24  ;;  %v4640_v20 = vadd.f32 %v646_v46, %v611_v28  ;;  %v835_v28 = vpop.permute.xlu1 %834 }
  0xbd   : >> { %v587_v27 = vadd.f32 %v578_v59, %v560_v29  ;;  %v649_v59 = vmul.f32 %v4483_v60, %v4622_v24  ;;  %v4646_v57 = vmul.f32 %v4486_v61, %v4629_v23  ;;  %v782_v36 = vrot.slane %v774_v25, 1 }
  0xbe   : >> { %v586_v47 = vadd.f32 %v579_v42, %v559_v38  ;;  %v4650_v42 = vmul.f32 %v4393_v2, %v4629_v23  ;;  %v648_v21 = vmul.f32 %v4483_v60, %v4629_v23  ;;  %v4656_v56 = vmul.f32 %v4629_v23, %v4458_v45 }
  0xbf   : >> { %v4660_v29 = vmul.f32 %v4629_v23, %v4470_v51  ;;  %v614_v38 = vadd.f32 %v605_v55, %v587_v27  ;;  %v805_v34 = vrot.slane %v797_v41, 2  ;;  %v755_v25 = vsel %vm506_vm6, %v752_v44, %v5139_v40 }
  0xc0   : >> { %v613_v46 = vadd.f32 %v606_v33, %v586_v47  ;;  %v5141_v49 = vrot.slane %v4656_v56, 1  ;;  %v763_v39 = vadd.f32 %v755_v25, %v4575_v11  ;;  %v848_v55 = vmul.f32 %v835_v28, %v4483_v60  ;;  %v830_v47 = vpop.permute.xlu0 %829 }
  0xc1   : >> { %v5140_v19 = vrot.slane %v4660_v29, 2  ;;  %v5149_v27 = vrot.slane %v4498_v8, 1  ;;  %v4685_v11 = vmul.f32 %v835_v28, %v4486_v61  ;;  %v4694_v8 = vmul.f32 %v4393_v2, %v835_v28 }
  0xc2   : >> { %v771_v40 = vadd.f32 %v767_v13, %v763_v39  ;;  %v786_v0 = vsel %vm478_vm5, %v783_v52, %v5141_v49  ;;  %v4688_v30 = vadd.f32 %v648_v21, %v613_v46  ;;  %v784_v33 = vsel %vm478_vm5, %v782_v36, %v783_v52 }
  0xc3   : >> { %v730_v41 = vsel %vm478_vm5, %v5149_v27, %v729_v22  ;;  %v809_v63 = vsel %vm506_vm6, %v806_v31, %v5140_v19  ;;  %v5150_v22 = vrot.slane %v4503_v18, 2  ;;  %v878_v21 = vmul.f32 %v4393_v2, %v830_v47 }
  0xc4   : >> { %v739_v25 = vadd.f32 %v730_v41, %v4511_v26  ;;  %v794_v13 = vadd.f32 %v786_v0, %v771_v40  ;;  %v855_v26 = vmul.f32 %v830_v47, %v4486_v61  ;;  %v4706_v46 = vmul.f32 %v4393_v2, %v4622_v24 }
  0xc5   : >> { %v753_v39 = vsel %vm506_vm6, %v5150_v22, %v752_v44  ;;  %v5151_v28 = vrot.slane %v4566_v35, 1  ;;  %v769_v18 = vmul.f32 %v4622_v24, %v4474_v53  ;;  %v864_v40 = vrot.slane %v4685_v11, 1 }
  0xc6   : >> { %v762_v27 = vadd.f32 %v753_v39, %v739_v25  ;;  %v863_v0 = vrot.slane %v855_v26, 1  ;;  %v777_v52 = vmul.f32 %v4622_v24, %v4458_v45  ;;  %v887_v36 = vrot.slane %v4694_v8, 2  ;;  %v845_v39 = vpop.permute.xlu1 %844 }
  0xc7   : >> { %v742_v10 = vadd.f32 %v5151_v28, %v4581_v9  ;;  %v807_v41 = vsel %vm506_vm6, %v805_v34, %v806_v31  ;;  %v5152_v25 = vrot.slane %v4573_v58, 2  ;;  %v800_v9 = vmul.f32 %v4622_v24, %v4470_v51 }
  0xc8   : >> { %v770_v44 = vadd.f32 %v766_v54, %v762_v27  ;;  %v817_v28 = vadd.f32 %v809_v63, %v794_v13  ;;  %v847_v11 = vmul.f32 %v830_v47, %v4483_v60  ;;  %v787_v54 = vrot.slane %v777_v52, 1 }
  0xc9   : >> { %v765_v22 = vadd.f32 %v5152_v25, %v742_v10  ;;  %v886_v27 = vrot.slane %v878_v21, 2  ;;  %v698_v26 = vrot.slane %v4706_v46, 2  ;;  %v653_v49 = vadd.f32 %v649_v59, %v614_v38  ;;  %v840_v46 = vpop.permute.xlu0 %839 }
  0xca   : >> { %v793_v19 = vadd.f32 %v784_v33, %v770_v44  ;;  %v865_v31 = vsel %vm478_vm5, %v863_v0, %v864_v40  ;;  %v858_v34 = vmul.f32 %v845_v39, %v4486_v61  ;;  %v881_v10 = vmul.f32 %v4393_v2, %v845_v39 }
  0xcb   : >> { %v773_v45 = vadd.f32 %v769_v18, %v765_v22  ;;  %v810_v51 = vrot.slane %v800_v9, 2  ;;  %v850_v24 = vmul.f32 %v845_v39, %v4483_v60  ;;  %v5153_v33 = vrot.slane %v4566_v35, 1 }
  0xcc   : >> { %v816_v8 = vadd.f32 %v807_v41, %v793_v19  ;;  %v5154_v47 = vrot.slane %v4522_v32, 1  ;;  %v852_v13 = vadd.f32 %v848_v55, %v817_v28  ;;  %v5155_v19 = vrot.slane %v4638_v37, 1 }
  0xcd   : >> { %v796_v25 = vadd.f32 %v787_v54, %v773_v45  ;;  %v868_v44 = vrot.slane %v858_v34, 1  ;;  %v5156_v0 = vrot.slane %v4573_v58, 2  ;;  %v5157_v52 = vrot.slane %v4544_v7, 2 }
  0xce   : >> { %v734_v63 = vsel %vm478_vm5, %v5154_v47, %v5153_v33  ;;  %v851_v21 = vadd.f32 %v847_v11, %v816_v8  ;;  %v680_v59 = vadd.f32 %v5155_v19, %v653_v49  ;;  %v768_v32 = vmul.f32 %v4629_v23, %v4474_v53 }
  0xcf   : >> { %v741_v38 = vadd.f32 %v734_v63, %v4550_v17  ;;  %v819_v18 = vadd.f32 %v810_v51, %v796_v25  ;;  %v757_v35 = vsel %vm506_vm6, %v5157_v52, %v5156_v0  ;;  %v888_v55 = vsel %vm506_vm6, %v886_v27, %v887_v36 }
  0xd0   : >> { %v874_v41 = vadd.f32 %v865_v31, %v851_v21  ;;  %v891_v22 = vrot.slane %v881_v10, 2  ;;  %v5158_v17 = vrot.slane %v4656_v56, 1  ;;  %v857_v28 = vmul.f32 %v840_v46, %v4486_v61 }
  0xd1   : >> { %v764_v9 = vadd.f32 %v757_v35, %v741_v38  ;;  %v854_v49 = vadd.f32 %v850_v24, %v819_v18  ;;  %v880_v58 = vmul.f32 %v4393_v2, %v840_v46  ;;  %v707_v7 = vadd.f32 %v698_v26, %v680_v59 }
  0xd2   : >> { %v788_v39 = vsel %vm478_vm5, %v5158_v17, %v787_v54  ;;  %v5159_v45 = vrot.slane %v4597_v48, 1  ;;  %v5160_v53 = vrot.slane %v4617_v50, 1  ;;  %v5161_v27 = vrot.slane %v4646_v57, 1 }
  0xd3   : >> { %v772_v11 = vadd.f32 %v768_v32, %v764_v9  ;;  %v877_v31 = vadd.f32 %v868_v44, %v854_v49  ;;  %v866_v54 = vrot.slane %v857_v28, 1  ;;  %v889_v34 = vrot.slane %v880_v58, 2 }
  0xd4   : >> { %v668_v23 = vsel %vm478_vm5, %v5160_v53, %v5159_v45  ;;  %v5162_v8 = vmov %v5159_v45  ;;  %v897_v10 = vadd.f32 %v888_v55, %v874_v41  ;;  %v849_v24 = vmul.f32 %v840_v46, %v4483_v60 }
  0xd5   : >> { %v670_v56 = vsel %vm478_vm5, %v5162_v8, %v5161_v27  ;;  %v677_v61 = vadd.f32 %v668_v23, %v4640_v20  ;;  %v795_v25 = vadd.f32 %v788_v39, %v772_v11  ;;  %v900_v50 = vadd.f32 %v891_v22, %v877_v31 }
  0xd6   : >> { %v678_v33 = vadd.f32 %v670_v56, %v4608_v6  ;;  %v5163_v47 = vrot.slane %v4660_v29, 2  ;;  %v867_v48 = vsel %vm478_vm5, %v864_v40, %v866_v54  ;;  %v5164_v21 = vrot.slane %v4600_v43, 2 }
  0xd7   : >> { %v5165_v19 = vrot.slane %v4620_v62, 2  ;;  %v869_v38 = vsel %vm478_vm5, %v866_v54, %v868_v44  ;;  %v875_v18 = vadd.f32 %v867_v48, %v852_v13  ;;  %v5166_v60 = vrot.slane %v4650_v42, 2  ;;  %v1084_v54 = vld [vmem:[%s5130_s6] sm:$0x1] (%p423_p11)  }
  0xd8   : >> { %v811_v63 = vsel %vm506_vm6, %v5163_v47, %v810_v51  ;;  %v5167_v6 = vmov %v5164_v21  ;;  %v890_v51 = vsel %vm506_vm6, %v887_v36, %v889_v34  ;;  %v5168_v0 = vrot.slane %v4638_v37, 1 }
  0xd9   : >> { %v695_v59 = vsel %vm506_vm6, %v5165_v19, %v5164_v21  ;;  %v818_v20 = vadd.f32 %v811_v63, %v795_v25  ;;  %v697_v29 = vsel %vm506_vm6, %v5167_v6, %v5166_v60  ;;  %v5169_v62 = vmov %v5161_v27 }
  0xda   : >> { %v704_v46 = vadd.f32 %v695_v59, %v677_v61  ;;  %v705_v40 = vadd.f32 %v697_v29, %v678_v33  ;;  %v672_v52 = vsel %vm478_vm5, %v5169_v62, %v5168_v0  ;;  %v901_v35 = vmax.f32 %v897_v10, 0.0 }
  0xdb   : >> { %v853_v32 = vadd.f32 %v849_v24, %v818_v20  ;;  %v898_v44 = vadd.f32 %v890_v51, %v875_v18  ;;  %v679_v13 = vadd.f32 %v672_v52, %v4688_v30  ;;  %v904_v41 = vmax.f32 %v900_v50, 0.0 }
  0xdc   : >> { %v708_v55 = vmax.f32 %v704_v46, 0.0  ;;  %v5170_v43 = vmov %v5166_v60  ;;  %v709_v17 = vmax.f32 %v705_v40, 0.0  ;;  %v892_v37 = vsel %vm506_vm6, %v889_v34, %v891_v22 }
  0xdd   : >> { %v699_v9 = vsel %vm506_vm6, %v5170_v43, %v698_v26  ;;  %v876_v36 = vadd.f32 %v869_v38, %v853_v32  ;;  %v902_v49 = vmax.f32 %v898_v44, 0.0  ;;  %v711_v57 = vmax.f32 %v707_v7, 0.0 }
  0xde   : >> { %v706_v39 = vadd.f32 %v699_v9, %v679_v13  ;;  %v905_v58 = vmax.f32 %v708_v55, %v901_v35 }
  0xdf   : >> { %v899_v28 = vadd.f32 %v892_v37, %v876_v36  ;;  %v906_v11 = vmax.f32 %v709_v17, %v902_v49  ;;  %v908_v45 = vmax.f32 %v711_v57, %v904_v41 }
  0xe0   : >> { %v710_v23 = vmax.f32 %v706_v39, 0.0 }
  0xe1   : >> { %v903_v53 = vmax.f32 %v899_v28, 0.0  ;;  %v3978_v30 = vpack.c.bf16 %v906_v11, %v905_v58 }
  0xe3   : >> { %3979 = vmatprep.subr.bf16.mxu0 %v3978_v30  ;;  %3989 = vmatprep.subr.bf16.mxu1 %v3978_v30  ;;  %v907_v42 = vmax.f32 %v710_v23, %v903_v53 }
  0xe4   : >> { %3981 = vmatpush3.bf16.msra.mxu0 %v3978_v30  ;;  %3991 = vmatpush3.bf16.msra.mxu1 %v3978_v30 }
  0xe5   : >> { %v3982_v26 = vpack.c.bf16 %v908_v45, %v907_v42 }
  0xe7   : >> { %3984 = vmatprep.subr.msk.bf16.mxu0 %vm3983_vm9, %v3982_v26  ;;  %3994 = vmatprep.subr.msk.bf16.mxu1 %vm3983_vm9, %v3982_v26 }
  0xe8   : >> { %3987 = vmatpush3.bf16.msk.msra.mxu0 %vm3983_vm9, %v3982_v26  ;;  %3997 = vmatpush3.bf16.msk.msra.mxu1 %vm3983_vm9, %v3982_v26 }
  0xeb   : >> { %3768 = vmatmul.mubr.msk.f32.vlgmr.msra.gmra.mrb[0].mxu0 %vm909_vm4, %v4419_v14  ;;  %3779 = vmatmul.mubr.msk.f32.vlgmr.msra.gmra.mrb[0].mxu1 %vm909_vm4, %v4425_v16 }
 0x1bc   : > { %425 = sbr.rel (!%p423_p11) target bundleno = 29 (0x1d), region = 135 }
 0x1be   : >> { %v3769_v22 = vpop.f32.mrb[0].mxu0  ;;  %v3780_v7 = vpop.f32.mrb[0].mxu1 }
 0x1bf   : >> { %v1077_v27 = vmax.f32 %v3769_v22, %v3780_v7  ;;  %v986_v8 = vpop.f32.mrb[1].mxu0  ;;  %v1067_v56 = vpop.f32.mrb[1].mxu1 }
 0x1c0   : >> { %v1076_v31 = vmax.f32 %v986_v8, %v1067_v56 }
 0x1c1   : >> { %1083 = vst.msk [vmem:[%s1079_s30 + $0x8] sm:$0x1f] %vm1082_vm10, %v1077_v27 }
 0x1c2   : >> { %1081 = vst.msk [vmem:[%s1079_s30] sm:$0xff] %vm1080_vm11, %v1076_v31 }
 0x1c3 LB: >> { %v1098_v1 = vld [vmem:[%s5127_s3] sm:$0x3f]  ;;  %v3537_v2 = vld [vmem:[%s5127_s3 + $0x8] sm:$0x3f]  ;;  %v3541_v3 = vld [vmem:[%s5127_s3 + $0x10] sm:$0x3f]  ;;  %s4263_s22 = sphi %s4802_s22, %s1091_s22   ;;  %v4259_v54 = vphi %v1084_v54, %v5172_v54  }
 0x1c4   : >> { %3781 = vmatprep.subr.msk.mxu1 %vm506_vm6, %v1098_v1  ;;  %3791 = vmatprep.subr.msk.mxu0 %vm506_vm6, %v3541_v3  ;;  %v3549_v5 = vld [vmem:[%s5127_s3 + $0x18] sm:$0x3f]  ;;  %s3640_s24 = sshll.u32 %s4263_s22, 5  ;;  %v3553_v47 = vld [vmem:[%s5127_s3 + $0x20] sm:$0x3f]  ;;  %v4268_v17 = vmov 0.0|0.0  }
 0x1c5   : >> { %3782 = vmatpush3.msk.msra.mxu1 %vm506_vm6, %v1098_v1  ;;  %3792 = vmatpush3.msk.msra.mxu0 %vm506_vm6, %v3541_v3  ;;  %s4829_s25 = scalar_lea.vmem [#allocation2], %s3640_s24  ;;  %v3557_v59 = vld [vmem:[%s5127_s3 + $0x28] sm:$0x3f]  ;;  %v3565_v60 = vld [vmem:[%s5127_s3 + $0x30] sm:$0x3f]  ;;  %vm4269_vm12 = vmmov 0  }
 0x1c6   : >> { %3786 = vmatprep.subr.msk.mxu1 %vm506_vm6, %v3537_v2  ;;  %3796 = vmatprep.subr.msk.mxu0 %vm506_vm6, %v3549_v5  ;;  %v3569_v29 = vld [vmem:[%s5127_s3 + $0x38] sm:$0x3f]  ;;  %v3573_v62 = vld [vmem:[%s5127_s3 + $0x40] sm:$0x3f]  ;;  %v4270_v39 = vmov 0.0   ;;  %vm2636_vm13 = vcmask 1042432  }
 0x1c7   : >> { %vm4271_vm14 = vmmov 1   ;;  %vm2632_vm0 = vcmask 89088   ;;  %vm2789_vm1 = vcmask 130048  }
 0x1c8   : >> { %vm4000_vm15 = vmpackc.low %vm2636_vm13, %vm4271_vm14 }
 0x1c9   : >> { %v1096_v14 = vld [vmem:[%s4829_s25] sm:$0xff]  ;;  %v1097_v16 = vld [vmem:[%s4829_s25 + $0x8] sm:$0x1f]  ;;  %v3547_v50 = vld [vmem:[%s4829_s25 + $0x10] sm:$0xff] }
 0x1ca   : >> { %3783 = vmatprep.mubr.msk.f32.mxu1 %vm1080_vm11, %v1096_v14  ;;  %v1279_v34 = vrot.slane %v1096_v14, 2  ;;  %v1280_v61 = vrot.slane %v1097_v16, 2  ;;  %v1190_v10 = vrot.slane %v1096_v14, 1  ;;  %v1191_v25 = vrot.slane %v1097_v16, 1  ;;  %v3548_v63 = vld [vmem:[%s4829_s25 + $0x18] sm:$0x1f] }
 0x1cb   : >> { %3784 = vmatmul.mubr.msk.f32.vlgmr.msra.gmra.mrb[0].mxu1 %vm1080_vm11, %v1097_v16  ;;  %v1461_v48 = vrot.slane %v3547_v50, 1  ;;  %v1462_v21 = vrot.slane %v3548_v63, 1  ;;  %v1550_v20 = vrot.slane %v3547_v50, 2  ;;  %v1551_v38 = vrot.slane %v3548_v63, 2  ;;  %v3563_v6 = vld [vmem:[%s4829_s25 + $0x20] sm:$0xff]  ;;  %v3597_v44 = vld [vmem:[%s4829_s25 + $0x30] sm:$0xff] }
 0x1cc   : >> { %3787 = vmatpush3.msk.msra.mxu1 %vm506_vm6, %v3537_v2  ;;  %v1281_v24 = vsel %vm506_vm6, %v1279_v34, %v1280_v61  ;;  %v1192_v33 = vsel %vm478_vm5, %v1190_v10, %v1191_v25  ;;  %v3564_v51 = vld [vmem:[%s4829_s25 + $0x28] sm:$0x1f]  ;;  %v1732_v46 = vrot.slane %v3563_v6, 1  ;;  %v1821_v52 = vrot.slane %v3563_v6, 2  ;;  %v3598_v13 = vld [vmem:[%s4829_s25 + $0x38] sm:$0x1f] }
 0x1cd   : >> { %3793 = vmatprep.mubr.msk.f32.mxu0 %vm1080_vm11, %v1281_v24  ;;  %3788 = vmatprep.mubr.msk.f32.mxu1 %vm1080_vm11, %v1192_v33  ;;  %v1463_v19 = vsel %vm478_vm5, %v1461_v48, %v1462_v21  ;;  %v1552_v18 = vsel %vm506_vm6, %v1550_v20, %v1551_v38  ;;  %v1733_v40 = vrot.slane %v3564_v51, 1  ;;  %v1822_v35 = vrot.slane %v3564_v51, 2  ;;  %s3612_s25 = smul.u32 80, %s4263_s22  ;;  %s1091_s22 = sadd.s32 1, %s4263_s22  }
 0x1ce   : >> { %3794 = vmatmul.mubr.msk.f32.vlgmr.msra.gmra.mrb[0].mxu0 %vm1080_vm11, %v1280_v61  ;;  %3826 = vmatprep.subr.msk.mxu1 %vm506_vm6, %v1098_v1  ;;  %v2460_v41 = vrot.slane %v3597_v44, 1  ;;  %v2461_v55 = vrot.slane %v3598_v13, 1  ;;  %v2544_v9 = vrot.slane %v3597_v44, 2  ;;  %v2545_v36 = vrot.slane %v3598_v13, 2  ;;  %p1088_p12 = scmp.ge.s32.totalorder %s1091_s22, 5  }
 0x1cf   : >> { %3797 = vmatpush3.msk.msra.mxu0 %vm506_vm6, %v3549_v5  ;;  %3798 = vmatprep.mubr.msk.f32.mxu0 %vm1080_vm11, %v3547_v50  ;;  %v1734_v0 = vsel %vm478_vm5, %v1732_v46, %v1733_v40  ;;  %v1823_v32 = vsel %vm506_vm6, %v1821_v52, %v1822_v35  ;;  %s4947_s13 = scalar_lea.vmem %s5129_s5, %s3612_s25  ;;  %v3182_v52 = vld [vmem:[%s5131_s7 + $0x8] sm:$0xff] (%p1088_p12)  ;;  %vm4273_vm2 = vmmov (%p1088_p12), 0   ;;  %vm3197_vm3 = vcmask (%p1088_p12), 982016   ;;  %s3633_s16 = sshll.u32 (%p1088_p12), %s4356_s21, 4 }
 0x1d0   : >> { %3801 = vmatprep.subr.msk.mxu0 %vm506_vm6, %v3553_v47  ;;  %v2462_v43 = vsel %vm478_vm5, %v2460_v41, %v2461_v55  ;;  %v2546_v49 = vsel %vm506_vm6, %v2544_v9, %v2545_v36  ;;  %v3615_v16 = vld [vmem:[%s4947_s13 + $0x10] sm:$0xff]  ;;  %v3616_v34 = vld [vmem:[%s4947_s13 + $0x18] sm:$0xff]  ;;  %v3272_v41 = vld [vmem:[%s5133_s9] sm:$0xff] (%p1088_p12)  ;;  %vm3288_vm4 = vcmask (%p1088_p12), 1043456   ;;  %vm3284_vm5 = vcmask (%p1088_p12), 687104   ;;  %s3377_s0 = sshll.u32 (%p1088_p12), %s4429_s15, 4  ;;  %s5079_s30 = scalar_lea.hbm (%p1088_p12), %s5135_s11, %s3633_s16  ;;  %s5081_s0 = int_to_ptr.vmem [resolvable:$true] %s3377_s0 }
 0x1d1   : > { %s5174_s12 = sand.u32 (%p1088_p12), 1, %s4243_s18   ;;  %s4177_s22 = scalar_lea.vmem (%p1088_p12), %s5081_s0, 16 }
 0x1d2   : > { %p4178_p13 = scmp.ne.s32.totalorder (%p1088_p12), %s5081_s0, %s4177_s22  ;;  %s4274_s21 = smov (%p1088_p12), [#allocation3]  }
 0x1d3   : >> { %3789 = vmatmul.mubr.msk.f32.vlgmr.msra.gmra.mrb[0].mxu1 %vm1080_vm11, %v1191_v25  ;;  %v4010_v25 = vpack.c.bf16 %v3616_v34, %v3615_v16  ;;  %v3282_v16 = vld [vmem:[%s5133_s9 + $0x50] sm:$0xf] (%p1088_p12)  ;;  %v3196_v34 = vld [vmem:[%s5132_s8] sm:$0x1] (%p1088_p12)  ;;  %s4181_s24 = sshll.u32 (%p1088_p12), %s4274_s21, 4  ;;  %s4182_s24 = int_to_ptr.vmem [resolvable:$false] %s4181_s24 }
 0x1d4   : >> { %3827 = vmatpush3.msk.msra.mxu1 %vm506_vm6, %v1098_v1  ;;  %3828 = vmatprep.mubr.msk.f32.mxu1 %vm1080_vm11, %v3547_v50  ;;  %p4179_p0 = pnand (%p1088_p12), %p4178_p13, %p4373_p5  ;;  %s4183_s29 = scalar_lea.vmem (%p1088_p12), %s4182_s24, 32 }
 0x1d5   : >> { %3831 = vmatprep.subr.msk.mxu1 %vm506_vm6, %v3537_v2  ;;  %p4184_p2 = scmp.lt.s32.totalorder (%p1088_p12), %s5081_s0, %s4182_s24  ;;  %p4185_p3 = scmp.lt.s32.totalorder (%p1088_p12), %s4183_s29, %s4177_s22 }
 0x1d6   : >> { %3799 = vmatmul.mubr.msk.f32.vlgmr.msra.gmra.mrb[0].mxu0 %vm1080_vm11, %v3548_v63  ;;  %p4180_p1 = pneg (%p1088_p12), %p4179_p0 }
 0x1d7   : >> { %3829 = vmatmul.mubr.msk.f32.vlgmr.msra.gmra.mrb[2].mxu1 %vm1080_vm11, %v3548_v63  ;;  %3802 = vmatpush3.msk.msra.mxu0 %vm506_vm6, %v3553_v47  ;;  %v3620_v63 = vld [vmem:[%s4947_s13 + $0x28] sm:$0xff]  ;;  %p4186_p4 = por (%p1088_p12), %p4185_p3, %p4184_p2 }
 0x1d8   : >> { %3832 = vmatpush3.msk.msra.mxu1 %vm506_vm6, %v3537_v2  ;;  %3803 = vmatprep.mubr.msk.f32.mxu0 %vm1080_vm11, %v1463_v19 }
 0x1d9   : >> { %3833 = vmatprep.mubr.msk.f32.mxu1 %vm1080_vm11, %v1463_v19  ;;  %3836 = vmatprep.subr.msk.mxu1 %vm506_vm6, %v3541_v3  ;;  %v3623_v19 = vld [vmem:[%s4947_s13 + $0x30] sm:$0xff]  ;;  %p4187_p7 = pnand (%p1088_p12), %p4186_p4, %p4180_p1 }
 0x1da   : >> { %3806 = vmatprep.subr.msk.mxu0 %vm506_vm6, %v3557_v59 }
 0x1de   : >> { %3804 = vmatmul.mubr.msk.f32.vlgmr.msra.gmra.mrb[0].mxu0 %vm1080_vm11, %v1462_v21 }
 0x1df   : >> { %3834 = vmatmul.mubr.msk.f32.vlgmr.msra.gmra.mrb[2].mxu1 %vm1080_vm11, %v1462_v21  ;;  %3807 = vmatpush3.msk.msra.mxu0 %vm506_vm6, %v3557_v59 }
 0x1e0   : >> { %3837 = vmatpush3.msk.msra.mxu1 %vm506_vm6, %v3541_v3  ;;  %3808 = vmatprep.mubr.msk.f32.mxu0 %vm1080_vm11, %v1552_v18  ;;  %v2787_v3 = vld [vmem:[%s4947_s13] sm:$0xff] }
 0x1e1   : >> { %3838 = vmatprep.mubr.msk.f32.mxu1 %vm1080_vm11, %v1552_v18  ;;  %3841 = vmatprep.subr.msk.mxu1 %vm506_vm6, %v3549_v5  ;;  %v3627_v18 = vld [vmem:[%s4947_s13 + $0x40] sm:$0xff] }
 0x1e2   : >> { %3811 = vmatprep.subr.msk.mxu0 %vm506_vm6, %v3565_v60 }
 0x1e6   : >> { %3809 = vmatmul.mubr.msk.f32.vlgmr.msra.gmra.mrb[0].mxu0 %vm1080_vm11, %v1551_v38 }
 0x1e7   : >> { %3839 = vmatmul.mubr.msk.f32.vlgmr.msra.gmra.mrb[2].mxu1 %vm1080_vm11, %v1551_v38  ;;  %3812 = vmatpush3.msk.msra.mxu0 %vm506_vm6, %v3565_v60 }
 0x1e8   : >> { %3842 = vmatpush3.msk.msra.mxu1 %vm506_vm6, %v3549_v5  ;;  %3813 = vmatprep.mubr.msk.f32.mxu0 %vm1080_vm11, %v3563_v6  ;;  %v2788_v5 = vld [vmem:[%s4947_s13 + $0x8] sm:$0xff] }
 0x1e9   : >> { %3843 = vmatprep.mubr.msk.f32.mxu1 %vm1080_vm11, %v3563_v6  ;;  %3846 = vmatprep.subr.msk.mxu1 %vm506_vm6, %v3553_v47  ;;  %v4007_v14 = vpack.c.bf16 %v2788_v5, %v2787_v3  ;;  %v3280_v3 = vld [vmem:[%s5133_s9 + $0x40] sm:$0xff] (%p1088_p12)  ;;  %v3281_v5 = vld [vmem:[%s5133_s9 + $0x48] sm:$0xff] (%p1088_p12) }
 0x1ea   : >> { %3816 = vmatprep.subr.msk.mxu0 %vm506_vm6, %v3569_v29 }
 0x1ee   : >> { %3814 = vmatmul.mubr.msk.f32.vlgmr.msra.gmra.mrb[0].mxu0 %vm1080_vm11, %v3564_v51 }
 0x1ef   : >> { %3844 = vmatmul.mubr.msk.f32.vlgmr.msra.gmra.mrb[2].mxu1 %vm1080_vm11, %v3564_v51  ;;  %3817 = vmatpush3.msk.msra.mxu0 %vm506_vm6, %v3569_v29 }
 0x1f0   : >> { %3847 = vmatpush3.msk.msra.mxu1 %vm506_vm6, %v3553_v47  ;;  %3818 = vmatprep.mubr.msk.f32.mxu0 %vm1080_vm11, %v1734_v0  ;;  %v3619_v47 = vld [vmem:[%s4947_s13 + $0x20] sm:$0xff] }
 0x1f1   : >> { %3848 = vmatprep.mubr.msk.f32.mxu1 %vm1080_vm11, %v1734_v0  ;;  %3851 = vmatprep.subr.msk.mxu1 %vm506_vm6, %v3557_v59  ;;  %v4013_v48 = vpack.c.bf16 %v3620_v63, %v3619_v47 }
 0x1f2   : >> { %3821 = vmatprep.subr.msk.mxu0 %vm506_vm6, %v3573_v62 }
 0x1f6   : >> { %3819 = vmatmul.mubr.msk.f32.vlgmr.msra.gmra.mrb[0].mxu0 %vm1080_vm11, %v1733_v40 }
 0x1f7   : >> { %3849 = vmatmul.mubr.msk.f32.vlgmr.msra.gmra.mrb[2].mxu1 %vm1080_vm11, %v1733_v40  ;;  %3822 = vmatpush3.msk.msra.mxu0 %vm506_vm6, %v3573_v62 }
 0x1f8   : >> { %3852 = vmatpush3.msk.msra.mxu1 %vm506_vm6, %v3557_v59  ;;  %3823 = vmatprep.mubr.msk.f32.mxu0 %vm1080_vm11, %v1823_v32  ;;  %v3624_v59 = vld [vmem:[%s4947_s13 + $0x38] sm:$0xff] }
 0x1f9   : >> { %3853 = vmatprep.mubr.msk.f32.mxu1 %vm1080_vm11, %v1823_v32  ;;  %3856 = vmatprep.subr.msk.mxu1 %vm506_vm6, %v3565_v60  ;;  %v4016_v20 = vpack.c.bf16 %v3624_v59, %v3623_v19 }
 0x1fa   : >> { %3998 = vmatprep.subr.bf16.mxu0 %v4268_v17 }
 0x1fe   : >> { %3824 = vmatmul.mubr.msk.f32.vlgmr.msra.gmra.mrb[0].mxu0 %vm1080_vm11, %v1822_v35 }
 0x1ff   : >> { %3854 = vmatmul.mubr.msk.f32.vlgmr.msra.gmra.mrb[2].mxu1 %vm1080_vm11, %v1822_v35  ;;  %3875 = vmatprep.mubr.msk.f32.mxu0 %vm4269_vm12, %v4270_v39  ;;  %v4272_v35 = vmov (%p1088_p12), 0.0|0.0  }
 0x200   : >> { %3857 = vmatpush3.msk.msra.mxu1 %vm506_vm6, %v3565_v60  ;;  %3858 = vmatprep.mubr.msk.f32.mxu1 %vm1080_vm11, %v3597_v44  ;;  %v3628_v60 = vld [vmem:[%s4947_s13 + $0x48] sm:$0xff]  ;;  %v3184_v44 = vld [vmem:[%s5131_s7 + $0x18] sm:$0xff] (%p1088_p12)  ;;  %s3365_s13 = scalar_lea.sflag (%p1088_p12), [#allocation4], %s5174_s12 }
 0x201   : >> { %3861 = vmatprep.subr.msk.mxu1 %vm506_vm6, %v3569_v29  ;;  %v4019_v6 = vpack.c.bf16 %v3628_v60, %v3627_v18 }
 0x207   : >> { %3859 = vmatmul.mubr.msk.f32.vlgmr.msra.gmra.mrb[2].mxu1 %vm1080_vm11, %v3598_v13  ;;  %v3186_v13 = vld [vmem:[%s5131_s7 + $0x28] sm:$0xff] (%p1088_p12) }
 0x208   : >> { %3862 = vmatpush3.msk.msra.mxu1 %vm506_vm6, %v3569_v29  ;;  %3863 = vmatprep.mubr.msk.f32.mxu1 %vm1080_vm11, %v2462_v43  ;;  %v3274_v43 = vld [vmem:[%s5133_s9 + $0x10] sm:$0xff] (%p1088_p12) }
 0x209   : >> { %3866 = vmatprep.subr.msk.mxu1 %vm506_vm6, %v3573_v62 }
 0x20f   : >> { %3864 = vmatmul.mubr.msk.f32.vlgmr.msra.gmra.mrb[2].mxu1 %vm1080_vm11, %v2461_v55  ;;  %v3273_v55 = vld [vmem:[%s5133_s9 + $0x8] sm:$0xff] (%p1088_p12) }
 0x210   : >> { %3867 = vmatpush3.msk.msra.mxu1 %vm506_vm6, %v3573_v62  ;;  %3868 = vmatprep.mubr.msk.f32.mxu1 %vm1080_vm11, %v2546_v49  ;;  %v3181_v62 = vld [vmem:[%s5131_s7] sm:$0xff] (%p1088_p12)  ;;  %v4043_v9 = vpack.c.bf16 (%p1088_p12), %v3273_v55, %v3272_v41  ;;  %vm3362_vm6 = vcmask (%p1088_p12), 73728  }
 0x211   : >> { %4002 = vmatprep.subr.bf16.mxu1 %v4268_v17  ;;  %v4022_v32 = vpack.c.bf16 (%p1088_p12), %v3182_v52, %v3181_v62 }
 0x217   : >> { %3869 = vmatmul.mubr.msk.f32.vlgmr.msra.gmra.mrb[2].mxu1 %vm1080_vm11, %v2545_v36  ;;  %v3275_v36 = vld [vmem:[%s5133_s9 + $0x18] sm:$0xff] (%p1088_p12) }
 0x218   : >> { %3882 = vmatprep.mubr.msk.f32.mxu1 %vm4269_vm12, %v4270_v39 }
 0x2a6   : >> { %v3790_v37 = vpop.f32.mrb[0].mxu1 }
 0x2a7   : >> { %v1266_v57 = vpop.f32.mrb[1].mxu1  ;;  %v4057_v28 = vadd.f32 %v3790_v37, %v4403_v4  ;;  %v4046_v37 = vpack.c.bf16 (%p1088_p12), %v3275_v36, %v3274_v43 }
 0x2a8   : >> { %v4059_v58 = vadd.f32 %v4403_v4, %v1266_v57  ;;  %v3276_v57 = vld [vmem:[%s5133_s9 + $0x20] sm:$0xff] (%p1088_p12) }
 0x2d1   : >> { %v3825_v11 = vpop.f32.mrb[0].mxu0 }
 0x2d2   : >> { %v4058_v45 = vadd.f32 %v4057_v28, %v3825_v11  ;;  %v1897_v53 = vpop.f32.mrb[1].mxu0  ;;  %v3277_v28 = vld [vmem:[%s5133_s9 + $0x28] sm:$0xff] (%p1088_p12)  ;;  %v3189_v11 = vld [vmem:[%s5131_s7 + $0x40] sm:$0xff] (%p1088_p12) }
 0x2d3   : >> { %v4060_v30 = vadd.f32 %v4059_v58, %v1897_v53  ;;  %v4049_v53 = vpack.c.bf16 (%p1088_p12), %v3277_v28, %v3276_v57 }
 0x2d4   : >> { %v1909_v7 = vmax.f32 %v4058_v45, 0.0  ;;  %v3190_v45 = vld [vmem:[%s5131_s7 + $0x48] sm:$0xff] (%p1088_p12) }
 0x2d5   : >> { %v1908_v8 = vmax.f32 %v4060_v30, 0.0  ;;  %v3278_v30 = vld [vmem:[%s5133_s9 + $0x30] sm:$0xff] (%p1088_p12) }
 0x2ea   : >> { %v3870_v23 = vpop.f32.mrb[2].mxu1 }
 0x2eb   : >> { %v4061_v42 = vadd.f32 %v3870_v23, %v4403_v4  ;;  %v2617_v26 = vpop.f32.mrb[3].mxu1  ;;  %v3279_v23 = vld [vmem:[%s5133_s9 + $0x38] sm:$0xff] (%p1088_p12) }
 0x2ec   : >> { %v4062_v22 = vadd.f32 %v4403_v4, %v2617_v26  ;;  %v5173_v4 = vmov (%p1088_p12), 0.0   ;;  %v3191_v26 = vld [vmem:[%s5131_s7 + $0x50] sm:$0xff] (%p1088_p12) }
 0x2ed   : >> { %v2629_v27 = vmax.f32 %v4061_v42, 0.0  ;;  %v4034_v42 = vpack.c.bf16 (%p1088_p12), %v3190_v45, %v3189_v11 }
 0x2ee   : >> { %v2628_v56 = vmax.f32 %v4062_v22, 0.0  ;;  %v3192_v22 = vld [vmem:[%s5131_s7 + $0x58] sm:$0xff] (%p1088_p12) }
 0x2ef   : >> { %v2631_v31 = vmax.f32 %v1909_v7, %v2629_v27  ;;  %v4052_v7 = vpack.c.bf16 (%p1088_p12), %v3279_v23, %v3278_v30  ;;  %v4037_v27 = vpack.c.bf16 (%p1088_p12), %v3192_v22, %v3191_v26 }
 0x2f0   : >> { %v2630_v1 = vmax.f32 %v1908_v8, %v2628_v56  ;;  %v3193_v8 = vld [vmem:[%s5131_s7 + $0x60] sm:$0xff] (%p1088_p12)  ;;  %v3194_v56 = vld [vmem:[%s5131_s7 + $0x68] sm:$0xff] (%p1088_p12) }
 0x2f2   : >> { %v3999_v2 = vpack.c.bf16 %v2631_v31, %v2630_v1  ;;  %v4040_v31 = vpack.c.bf16 (%p1088_p12), %v3194_v56, %v3193_v8  ;;  %v3195_v1 = vld [vmem:[%s5131_s7 + $0x70] sm:$0xff] (%p1088_p12) }
 0x2f4   : >> { %4001 = vmatpush3.bf16.msk.msra.mxu0 %vm4000_vm15, %v3999_v2  ;;  %4005 = vmatpush3.bf16.msk.msra.mxu1 %vm4000_vm15, %v3999_v2 }
 0x2f5   : >> { %4006 = vmatprep.subr.bf16.mxu0 %v4268_v17  ;;  %4042 = vmatprep.subr.bf16.mxu1 (%p1088_p12), %v4272_v35 }
 0x2f7   : >> { %3876 = vmatmul.mubr.msk.f32.vlgmr.msra.gmra.mrb[2].mxu0 %vm2632_vm0, %v4416_v12  ;;  %3883 = vmatmul.mubr.msk.f32.vlgmr.msra.gmra.mrb[4].mxu1 %vm2632_vm0, %v4422_v15  ;;  %v3185_v15 = vld [vmem:[%s5131_s7 + $0x20] sm:$0xff] (%p1088_p12) }
 0x2f8   : >> { %3889 = vmatprep.mubr.msk.f32.mxu0 %vm4269_vm12, %v4270_v39  ;;  %4008 = vmatpush3.bf16.msra.mxu0 %v4007_v14  ;;  %v4028_v49 = vpack.c.bf16 (%p1088_p12), %v3186_v13, %v3185_v15  ;;  %v4055_v14 = vpack.c.bf16 (%p1088_p12), %v3281_v5, %v3280_v3 }
 0x2f9   : >> { %4009 = vmatprep.subr.bf16.mxu0 %v4268_v17  ;;  %3975 = vmatprep.mubr.msk.f32.mxu1 (%p1088_p12), %vm4273_vm2, %v5173_v4 }
 0x2fa   : > { %4044 = vmatpush3.bf16.msra.mxu1 (%p1088_p12), %v4043_v9 }
 0x2fb   : > { %4045 = vmatprep.subr.bf16.mxu1 (%p1088_p12), %v4272_v35 }
 0x2fe   : > { %4047 = vmatpush3.bf16.msra.mxu1 (%p1088_p12), %v4046_v37 }
 0x2ff   : > { %4048 = vmatprep.subr.bf16.mxu1 (%p1088_p12), %v4272_v35 }
 0x302   : > { %4050 = vmatpush3.bf16.msra.mxu1 (%p1088_p12), %v4049_v53 }
 0x303   : > { %4051 = vmatprep.subr.bf16.mxu1 (%p1088_p12), %v4272_v35 }
 0x306   : > { %4053 = vmatpush3.bf16.msra.mxu1 (%p1088_p12), %v4052_v7 }
 0x307   : > { %4054 = vmatprep.subr.bf16.mxu1 (%p1088_p12), %v4272_v35 }
 0x30a   : > { %4056 = vmatpush3.bf16.msra.mxu1 (%p1088_p12), %v4055_v14 }
 0x30b   : > { %3973 = vmatprep.subr.mxu1 (%p1088_p12), %v5173_v4 }
 0x30e   : > { %3974 = vmatpush3.msk.msra.mxu1 (%p1088_p12), %vm3288_vm4, %v3282_v16 }
 0x3ca   : >> { %v2706_v61 = vpop.f32.mrb[2].mxu0  ;;  %v2779_v10 = vpop.f32.mrb[4].mxu1 }
 0x3cb   : >> { %v2783_v24 = vmax.f32 %v2706_v61, %v2779_v10  ;;  %v3877_v33 = vpop.f32.mrb[3].mxu0  ;;  %v3884_v50 = vpop.f32.mrb[5].mxu1 }
 0x3cc   : > { %v3283_v33 = vld [vmem:[%s5134_s10] sm:$0x1] (%p1088_p12) }
 0x3cd   : >> { %3890 = vmatmul.mubr.msk.f32.vlgmr.msra.gmra.mrb[4].mxu0 %vm2789_vm1, %v2783_v24  ;;  %v2869_v21 = vrot.slane %v2783_v24, 1  ;;  %v2948_v38 = vrot.slane %v2783_v24, 2  ;;  %v3027_v29 = vrot.slane %v2783_v24, 3  ;;  %v3106_v51 = vrot.slane %v2783_v24, 4 }
 0x3ce   : >> { %4011 = vmatpush3.bf16.msra.mxu0 %v4010_v25  ;;  %3896 = vmatprep.mubr.msk.f32.mxu0 %vm4269_vm12, %v4270_v39 }
 0x3cf   : >> { %4012 = vmatprep.subr.bf16.mxu0 %v4268_v17 }
 0x3d5   : >> { %3897 = vmatmul.mubr.msk.f32.vlgmr.msra.gmra.mrb[4].mxu0 %vm2789_vm1, %v2869_v21 }
 0x3d6   : >> { %4014 = vmatpush3.bf16.msra.mxu0 %v4013_v48  ;;  %3903 = vmatprep.mubr.msk.f32.mxu0 %vm4269_vm12, %v4270_v39 }
 0x3d7   : >> { %4015 = vmatprep.subr.bf16.mxu0 %v4268_v17 }
 0x3dd   : >> { %3904 = vmatmul.mubr.msk.f32.vlgmr.msra.gmra.mrb[4].mxu0 %vm2789_vm1, %v2948_v38 }
 0x3de   : >> { %4017 = vmatpush3.bf16.msra.mxu0 %v4016_v20  ;;  %3910 = vmatprep.mubr.msk.f32.mxu0 %vm4269_vm12, %v4270_v39 }
 0x3df   : >> { %4018 = vmatprep.subr.bf16.mxu0 %v4268_v17  ;;  %v3187_v17 = vld [vmem:[%s5131_s7 + $0x30] sm:$0xff] (%p1088_p12) }
 0x3e5   : >> { %3911 = vmatmul.mubr.msk.f32.vlgmr.msra.gmra.mrb[4].mxu0 %vm2789_vm1, %v3027_v29 }
 0x3e6   : >> { %4020 = vmatpush3.bf16.msra.mxu0 %v4019_v6  ;;  %3917 = vmatprep.mubr.msk.f32.mxu0 %vm4269_vm12, %v4270_v39  ;;  %v3188_v39 = vld [vmem:[%s5131_s7 + $0x38] sm:$0xff] (%p1088_p12) }
 0x3e7   : > { %4021 = vmatprep.subr.bf16.mxu0 (%p1088_p12), %v4272_v35  ;;  %v4031_v58 = vpack.c.bf16 (%p1088_p12), %v3188_v39, %v3187_v17 }
 0x3ed   : >> { %3918 = vmatmul.mubr.msk.f32.vlgmr.msra.gmra.mrb[4].mxu0 %vm2789_vm1, %v3106_v51 }
 0x3ee   : > { %3950 = vmatprep.mubr.msk.f32.mxu0 (%p1088_p12), %vm4273_vm2, %v5173_v4  ;;  %4023 = vmatpush3.bf16.msra.mxu0 (%p1088_p12), %v4022_v32 }
 0x3ef   : > { %4024 = vmatprep.subr.bf16.mxu0 (%p1088_p12), %v4272_v35 }
 0x4be   : > { %1090 = sbr.rel (!%p1088_p12) target bundleno = 451 (0x1c3), region = 146 }
 0x4c0   : >> { %v3175_v46 = vpop.f32.mrb[4].mxu0 }
 0x4c1   : >> { %v4977_v54 = vadd.f32 %v4259_v54, %v3175_v46   ;;  %v3919_v0 = vpop.f32.mrb[5].mxu0 }
 0x4c3   : >> { %v5171_v40 = vmov %v4977_v54 }
 0x4c4   : >> { %v5172_v54 = vmov %v5171_v40  ;;  %v3180_v2 = vmax.f32 (%p1088_p12), %v5171_v40, 0.0 }
 0x4c5   : > { %v3183_v54 = vld [vmem:[%s5131_s7 + $0x10] sm:$0xff] }
 0x4c6   : > { %v4025_v12 = vpack.c.bf16 %v3184_v44, %v3183_v54 }
 0x4c8   : > { %4026 = vmatpush3.bf16.msra.mxu0 %v4025_v12 }
 0x4c9   : > { %4027 = vmatprep.subr.bf16.mxu0 %v4272_v35 }
 0x4cc   : > { %4029 = vmatpush3.bf16.msra.mxu0 %v4028_v49 }
 0x4cd   : > { %4030 = vmatprep.subr.bf16.mxu0 %v4272_v35 }
 0x4d0   : > { %4032 = vmatpush3.bf16.msra.mxu0 %v4031_v58 }
 0x4d1   : > { %4033 = vmatprep.subr.bf16.mxu0 %v4272_v35 }
 0x4d4   : > { %4035 = vmatpush3.bf16.msra.mxu0 %v4034_v42 }
 0x4d5   : > { %4036 = vmatprep.subr.bf16.mxu0 %v4272_v35 }
 0x4d8   : > { %4038 = vmatpush3.bf16.msra.mxu0 %v4037_v27 }
 0x4d9   : > { %4039 = vmatprep.subr.bf16.mxu0 %v4272_v35 }
 0x4dc   : > { %4041 = vmatpush3.bf16.msra.mxu0 %v4040_v31 }
 0x4dd   : > { %3948 = vmatprep.subr.mxu0 %v5173_v4 }
 0x4e0   : > { %3949 = vmatpush3.msra.mxu0 %v3195_v1 }
 0x4e1   : > { %3951 = vmatmul.mubr.msk.f32.vlgmr.msra.gmra.mrb[0].mxu0 %vm3197_vm3, %v3180_v2 }
 0x5b4   : > { %v3267_v61 = vpop.f32.mrb[0].mxu0 }
 0x5b5   : > { %v3268_v10 = vadd.f32 %v3267_v61, %v3196_v34  ;;  %v3952_v25 = vpop.f32.mrb[1].mxu0 }
 0x5b7   : > { %v3271_v24 = vmax.f32 %v3268_v10, 0.0 }
 0x5b9   : > { %3976 = vmatmul.mubr.msk.f32.vlgmr.msra.gmra.mrb[0].mxu1 %vm3284_vm5, %v3271_v24 }
 0x68c   : > { %v3358_v50 = vpop.f32.mrb[0].mxu1 }
 0x68d   : > { %v3359_v47 = vadd.f32 %v3358_v50, %v3283_v33  ;;  %v3977_v63 = vpop.f32.mrb[1].mxu1 }
 0x68f   : > { %3363 = vst.msk [vmem:[%s4429_s15] sm:$0x1] %vm3362_vm6, %v3359_v47 }
 0x690   : > { %4190 = shalt.err (!%p4187_p7)
}
 0x691   : > { %s4191_s15 = scalar_lea.hbm %s5079_s30, 16  ;;  %s4195_s25 = scalar_lea.hbm %s5135_s11, 32 }
 0x692   : > { %p4192_p8 = scmp.ne.s32.totalorder %s5079_s30, %s4191_s15  ;;  %p4196_p11 = scmp.lt.u32.totalorder %s5079_s30, %s5135_s11 }
 0x693   : > { %p4197_p12 = scmp.lt.u32.totalorder %s4195_s25, %s4191_s15  ;;  %p4199_p0 = scmp.lt.u32.totalorder %s4191_s15, %s5079_s30 }
 0x694   : > { %p4193_p9 = pnand %p4192_p8, %p4373_p5 }
 0x695   : > { %p4198_p13 = por %p4197_p12, %p4196_p11 }
 0x696   : > { %p4194_p10 = pneg %p4193_p9 }
 0x697   : > { %p4200_p1 = por %p4199_p0, %p4198_p13 }
 0x699   : > { %p4201_p2 = pnand %p4200_p1, %p4194_p10 }
 0x69b   : > { %4204 = shalt.err (!%p4201_p2)
}
 0x69c   : > { %4103 = dma.vmem_to_hbm [thread:$0]  (%p4373_p5), %s5081_s0, 16, %s5079_s30, %s3365_s13  }
 0x69d PF: > { %p4109_p3 = scmp.ge.s32.totalorder %s4251_s20, 2  ;;  %s3389_s22 = sand.u32 1, %s4239_s17  }
 0x69e   : > { %s3390_s21 = scalar_lea.sflag [#allocation4], %s3389_s22 }
 0x69f   : > { %p4106_p4 = pnand %p4109_p3, %p4377_p6 }
 0x6a1   : > { %4234 = dma.done.wait (!%p4106_p4), %s3390_s21, 16  }
 0x6a2   : > { %4236 = vsyncadd (!%p4106_p4), %s3390_s21, 4294967280  ;;  %p21_p7 = scmp.ge.s32.totalorder %s4360_s23, 4   ;;  %s5175_s17 = smov %s4243_s18 }
 0x6a3   : > { %s5176_s18 = smov %s4247_s19  ;;  %s5177_s19 = smov %s4371_s26 }
 0x6a4   : > { %s5178_s20 = smov %s4360_s23  ;;  %23 = sbr.rel (!%p21_p7) target bundleno = 6 (0x6), region = 157 }
 0x6ab   :  { %3394 = vsyncpa [#allocation4], 1 }
 0x6ac   :  { %3396 = vsyncpa [#allocation4 + $0x1], 1 }

</bundles_post_ra>
